<compile_context>
chip_gen: v6e
topology: v6e:2x2x1
jax: 0.10.0
libtpu: 0.0.40
codegen_flags: <defaults>
</compile_context>

<pallas_src>
import math
import functools

import jax
import jax.numpy as jnp
from jax.experimental import pallas as pl
from jax.experimental.pallas import tpu as pltpu


# -----------------------------------------------------------------------------
# Helpers
# -----------------------------------------------------------------------------
def _round_up(x, m):
    return (x + m - 1) // m * m


def _pad_axis(a, axis, target):
    pad = target - a.shape[axis]
    if pad == 0:
        return a
    cfg = [(0, 0)] * a.ndim
    cfg[axis] = (0, pad)
    return jnp.pad(a, cfg)


def _pad2d(w, rows, cols):
    return _pad_axis(_pad_axis(w, 0, rows), 1, cols)


# Row indices inside the packed "small params" tile.
_SMALL_ROWS = ("bq_s", "bo_s", "bq_c", "bo_c", "b2",
               "g1", "be1", "g2", "be2", "g3", "be3")
_NSMALL = 16  # padded to a sublane-aligned tile


# -----------------------------------------------------------------------------
# Kernel: one full decoder layer for a single batch element.
# -----------------------------------------------------------------------------
def decoder_layer_kernel(
    x_ref, z_ref,
    wq_s_ref, wo_s_ref,          # self-attention weights (q_linear, out)
    wq_c_ref, wo_c_ref,          # cross-attention weights (q_linear, out)
    w1_ref, w2_ref,              # feed-forward weights
    b1_ref,                      # feed-forward bias 1 (1, Fp), f32
    small_ref,                   # packed biases + LN gamma/beta (16, Dp), f32
    o_ref,
    *, d_model,
):
    cdt = x_ref.dtype            # MXU input dtype (bf16 stays bf16, f32 stays f32)
    Dp = x_ref.shape[-1]         # lane-padded d_model

    x = x_ref[...]               # (S,  Dp)
    z = z_ref[...]               # (Sz, Dp)

    small = small_ref[...].astype(jnp.float32)        # (16, Dp)
    bq_s, bo_s = small[0:1], small[1:2]
    bq_c, bo_c = small[2:3], small[3:4]
    b2 = small[4:5]
    g1, be1 = small[5:6], small[6:7]
    g2, be2 = small[7:8], small[8:9]
    g3, be3 = small[9:10], small[10:11]
    b1 = b1_ref[...].astype(jnp.float32)              # (1, Fp)

    inv_sqrt_dk = 1.0 / math.sqrt(d_model)            # num_heads == 1 -> d_k == d_model
    inv_d = 1.0 / d_model

    # Lane mask over the true (unpadded) feature width for LayerNorm variance.
    lane = jax.lax.broadcasted_iota(jnp.int32, (1, Dp), 1)
    feat_mask = (lane < d_model).astype(jnp.float32)  # (1, Dp)

    def matmul(a, b):
        # a @ b, narrow MXU inputs, f32 accumulation.
        return jax.lax.dot_general(
            a.astype(cdt), b.astype(cdt),
            (((1,), (0,)), ((), ())),
            preferred_element_type=jnp.float32)

    def matmul_nt(a, b):
        # a @ b^T without an explicit XLU transpose (contract last dims).
        return jax.lax.dot_general(
            a.astype(cdt), b.astype(cdt),
            (((1,), (1,)), ((), ())),
            preferred_element_type=jnp.float32)

    def softmax(s):                                    # s: f32 (Sq, Sk)
        s = s - jnp.max(s, axis=-1, keepdims=True)
        p = jnp.exp(s)
        denom = jnp.sum(p, axis=-1, keepdims=True)
        return p / denom                               # exact f32 divide

    def layernorm(t, g, b):                            # t: f32 (S, Dp)
        mu = jnp.sum(t, axis=-1, keepdims=True) * inv_d
        d = (t - mu) * feat_mask
        var = jnp.sum(d * d, axis=-1, keepdims=True) * inv_d
        return (t - mu) * jax.lax.rsqrt(var + 1e-5) * g + b

    # ---- 1) self-attention + residual + LN1 ---------------------------------
    # q_linear is used for q, k and v in the reference, and q_in == kv_in here,
    # so a single projection gives q == k == v.
    qkv = matmul(x, wq_s_ref[...]) + bq_s                        # (S, Dp) f32
    scores = matmul_nt(qkv * inv_sqrt_dk, qkv)                   # (S, S)  f32
    ctx = matmul(softmax(scores), qkv)                           # (S, Dp) f32
    s_a = matmul(ctx, wo_s_ref[...]) + bo_s
    xf = layernorm(x.astype(jnp.float32) + s_a, g1, be1)

    # ---- 2) cross-attention (q from x, k == v from z) + residual + LN2 ------
    q = matmul(xf, wq_c_ref[...]) + bq_c                         # (S,  Dp)
    kv = matmul(z, wq_c_ref[...]) + bq_c                         # (Sz, Dp)  (k == v)
    scores = matmul_nt(q * inv_sqrt_dk, kv)                      # (S, Sz)
    ctx = matmul(softmax(scores), kv)
    c_a = matmul(ctx, wo_c_ref[...]) + bo_c
    xf = layernorm(xf + c_a, g2, be2)

    # ---- 3) feed-forward (linear1 -> ReLU -> linear2) + residual + LN3 ------
    h = jnp.maximum(matmul(xf, w1_ref[...]) + b1, 0.0)           # (S, Fp)
    ff = matmul(h, w2_ref[...]) + b2                             # (S, Dp)
    xf = layernorm(xf + ff, g3, be3)

    o_ref[...] = xf.astype(o_ref.dtype)


# -----------------------------------------------------------------------------
# Wrapper
# -----------------------------------------------------------------------------
def decoder_layer(x, z, params):
    B, S, D = x.shape
    Bz, Sz, Dz = z.shape
    assert Bz == B and Dz == D
    d_ff = params["w1"].shape[1]

    Dp = _round_up(D, 128)
    Fp = _round_up(d_ff, 128)
    dt = x.dtype

    # Lane-pad activations and weights with zeros (keeps padded lanes exactly 0).
    xp = _pad_axis(x, 2, Dp)
    zp = _pad_axis(z, 2, Dp)
    wq_s = _pad2d(params["wq_s"], Dp, Dp).astype(dt)
    wo_s = _pad2d(params["wo_s"], Dp, Dp).astype(dt)
    wq_c = _pad2d(params["wq_c"], Dp, Dp).astype(dt)
    wo_c = _pad2d(params["wo_c"], Dp, Dp).astype(dt)
    w1 = _pad2d(params["w1"], Dp, Fp).astype(dt)
    w2 = _pad2d(params["w2"], Fp, Dp).astype(dt)

    b1 = _pad_axis(params["b1"].reshape(1, -1).astype(jnp.float32), 1, Fp)
    small = jnp.zeros((_NSMALL, Dp), jnp.float32)
    for i, k in enumerate(_SMALL_ROWS):
        row = _pad_axis(params[k].reshape(-1).astype(jnp.float32), 0, Dp)
        small = small.at[i].set(row)

    def const2d(shape):
        return pl.BlockSpec(shape, lambda b: (0, 0))

    in_specs = [
        pl.BlockSpec((pl.Squeezed(), S, Dp), lambda b: (b, 0, 0)),    # x
        pl.BlockSpec((pl.Squeezed(), Sz, Dp), lambda b: (b, 0, 0)),   # z
        const2d((Dp, Dp)), const2d((Dp, Dp)),                         # wq_s, wo_s
        const2d((Dp, Dp)), const2d((Dp, Dp)),                         # wq_c, wo_c
        const2d((Dp, Fp)), const2d((Fp, Dp)),                         # w1, w2
        const2d((1, Fp)),                                             # b1
        const2d((_NSMALL, Dp)),                                       # packed small params
    ]
    out_spec = pl.BlockSpec((pl.Squeezed(), S, Dp), lambda b: (b, 0, 0))

    # Explicit VMEM budget: double-buffered blocks + f32 intermediates + headroom.
    itemsize = jnp.dtype(dt).itemsize
    block_bytes = ((2 * S + Sz) * Dp * itemsize                     # x, z, out blocks
                   + (4 * Dp * Dp + 2 * Dp * Fp) * itemsize         # weights
                   + (Fp + _NSMALL * Dp) * 4)                       # small f32 params
    scratch_bytes = (S * max(S, Sz) + 6 * S * Dp + S * Fp) * 4
    vmem_limit = int(min(max(2 * block_bytes + scratch_bytes + (2 << 20), 8 << 20),
                         48 << 20))

    kernel = functools.partial(decoder_layer_kernel, d_model=D)

    out_padded = pl.pallas_call(
        kernel,
        out_shape=jax.ShapeDtypeStruct((B, S, Dp), dt),
        grid_spec=pltpu.PrefetchScalarGridSpec(
            num_scalar_prefetch=0,
            grid=(B,),
            in_specs=in_specs,
            out_specs=out_spec,
        ),
        compiler_params=pltpu.CompilerParams(
            dimension_semantics=("parallel",),
            vmem_limit_bytes=vmem_limit,
        ),
    )(xp, zp, wq_s, wo_s, wq_c, wo_c, w1, w2, b1, small)

    return out_padded[:, :, :D]


# -----------------------------------------------------------------------------
# Pure-JAX reference (for a sanity check)
# -----------------------------------------------------------------------------
def decoder_layer_ref(x, z, p):
    D = x.shape[-1]

    def lin(t, w, b):
        return t @ w + b

    def attn(q_in, kv_in, wq, bq, wo, bo):
        q = lin(q_in, wq, bq)
        k = lin(kv_in, wq, bq)
        v = lin(kv_in, wq, bq)
        s = jnp.einsum("bqd,bkd->bqk", q, k) / math.sqrt(D)
        a = jax.nn.softmax(s, axis=-1)
        return lin(jnp.einsum("bqk,bkd->bqd", a, v), wo, bo)

    def ln(t, g, b):
        mu = t.mean(-1, keepdims=True)
        var = ((t - mu) ** 2).mean(-1, keepdims=True)
        return (t - mu) / jnp.sqrt(var + 1e-5) * g + b

    x1 = ln(x + attn(x, x, p["wq_s"], p["bq_s"], p["wo_s"], p["bo_s"]), p["g1"], p["be1"])
    x2 = ln(x1 + attn(x1, z, p["wq_c"], p["bq_c"], p["wo_c"], p["bo_c"]), p["g2"], p["be2"])
    ff = lin(jnp.maximum(lin(x2, p["w1"], p["b1"]), 0.0), p["w2"], p["b2"])
    return ln(x2 + ff, p["g3"], p["be3"])


# -----------------------------------------------------------------------------
# Main
# -----------------------------------------------------------------------------
if __name__ == "__main__":
    B, S, Sz, D, D_FF = 2, 8, 8, 32, 64

    key = jax.random.PRNGKey(0)
    ks = jax.random.split(key, 16)

    def winit(k, shape, fan_in):
        bound = 1.0 / math.sqrt(fan_in)
        return jax.random.uniform(k, shape, jnp.float32, -bound, bound)

    params = {
        # self-attention (q_linear, out) — stored as (in, out)
        "wq_s": winit(ks[0], (D, D), D), "bq_s": winit(ks[1], (D,), D),
        "wo_s": winit(ks[2], (D, D), D), "bo_s": winit(ks[3], (D,), D),
        # cross-attention
        "wq_c": winit(ks[4], (D, D), D), "bq_c": winit(ks[5], (D,), D),
        "wo_c": winit(ks[6], (D, D), D), "bo_c": winit(ks[7], (D,), D),
        # feed-forward
        "w1": winit(ks[8], (D, D_FF), D), "b1": winit(ks[9], (D_FF,), D),
        "w2": winit(ks[10], (D_FF, D), D_FF), "b2": winit(ks[11], (D,), D_FF),
        # layernorms
        "g1": jnp.ones((D,), jnp.float32), "be1": jnp.zeros((D,), jnp.float32),
        "g2": jnp.ones((D,), jnp.float32), "be2": jnp.zeros((D,), jnp.float32),
        "g3": jnp.ones((D,), jnp.float32), "be3": jnp.zeros((D,), jnp.float32),
    }

    x = jax.random.normal(ks[12], (B, S, D), jnp.float32)
    z = jax.random.normal(ks[13], (B, Sz, D), jnp.float32)

    ref = decoder_layer_ref(x, z, params)

    # f32 path: exact-math kernel (only accumulation-order differences).
    out = jax.block_until_ready(decoder_layer(x, z, params))
    assert out.shape == (B, S, D)
    assert jnp.allclose(out, ref, atol=1e-3, rtol=1e-3), "f32 mismatch vs JAX reference"

    # bf16 fast path (bf16 MXU inputs, f32 accumulation / statistics).
    # Loose tolerance: inputs and every matmul operand are rounded to bf16.
    out_bf16 = jax.block_until_ready(
        decoder_layer(x.astype(jnp.bfloat16), z.astype(jnp.bfloat16), params))
    assert jnp.allclose(out_bf16.astype(jnp.float32), ref, atol=1e-1, rtol=1e-1), \
        "bf16 mismatch vs JAX reference"

    print("KERNEL_OK")
</pallas_src>

<mosaic_0001>
module attributes {stable_mosaic.version = 11 : i64} {
  func.func @decoder_layer_kernel(%arg0: i32, %arg1: memref<1x8x128xf32, #tpu.memory_space<vmem>>, %arg2: memref<1x8x128xf32, #tpu.memory_space<vmem>>, %arg3: memref<128x128xf32, #tpu.memory_space<vmem>>, %arg4: memref<128x128xf32, #tpu.memory_space<vmem>>, %arg5: memref<128x128xf32, #tpu.memory_space<vmem>>, %arg6: memref<128x128xf32, #tpu.memory_space<vmem>>, %arg7: memref<128x128xf32, #tpu.memory_space<vmem>>, %arg8: memref<128x128xf32, #tpu.memory_space<vmem>>, %arg9: memref<1x128xf32, #tpu.memory_space<vmem>>, %arg10: memref<16x128xf32, #tpu.memory_space<vmem>>, %arg11: memref<1x8x128xf32, #tpu.memory_space<vmem>>) attributes {dimension_semantics = [#tpu.dimension_semantics<parallel>], iteration_bounds = array<i64: 2>, scalar_prefetch = 0 : i64, scratch_operands = 0 : i64, tpu.core_type = #tpu.core_type<tc>, window_params = [{transform_indices = @transform_0, window_bounds = array<i64: 1, 8, 128>}, {transform_indices = @transform_1, window_bounds = array<i64: 1, 8, 128>}, {pipeline_mode = #tpu.pipeline_mode<synchronous>, transform_indices = @transform_2, window_bounds = array<i64: 128, 128>}, {pipeline_mode = #tpu.pipeline_mode<synchronous>, transform_indices = @transform_3, window_bounds = array<i64: 128, 128>}, {pipeline_mode = #tpu.pipeline_mode<synchronous>, transform_indices = @transform_4, window_bounds = array<i64: 128, 128>}, {pipeline_mode = #tpu.pipeline_mode<synchronous>, transform_indices = @transform_5, window_bounds = array<i64: 128, 128>}, {pipeline_mode = #tpu.pipeline_mode<synchronous>, transform_indices = @transform_6, window_bounds = array<i64: 128, 128>}, {pipeline_mode = #tpu.pipeline_mode<synchronous>, transform_indices = @transform_7, window_bounds = array<i64: 128, 128>}, {pipeline_mode = #tpu.pipeline_mode<synchronous>, transform_indices = @transform_8, window_bounds = array<i64: 1, 128>}, {pipeline_mode = #tpu.pipeline_mode<synchronous>, transform_indices = @transform_9, window_bounds = array<i64: 16, 128>}, {transform_indices = @transform_10, window_bounds = array<i64: 1, 8, 128>}]} {
    %c0 = arith.constant 0 : index
    %c0_0 = arith.constant 0 : index
    %c0_1 = arith.constant 0 : index
    %0 = vector.load %arg1[%c0, %c0_0, %c0_1] : memref<1x8x128xf32, #tpu.memory_space<vmem>>, vector<1x8x128xf32>
    %1 = vector.shape_cast %0 : vector<1x8x128xf32> to vector<8x128xf32>
    %c0_2 = arith.constant 0 : index
    %c0_3 = arith.constant 0 : index
    %c0_4 = arith.constant 0 : index
    %2 = vector.load %arg2[%c0_2, %c0_3, %c0_4] : memref<1x8x128xf32, #tpu.memory_space<vmem>>, vector<1x8x128xf32>
    %3 = vector.shape_cast %2 : vector<1x8x128xf32> to vector<8x128xf32>
    %c0_5 = arith.constant 0 : index
    %c0_6 = arith.constant 0 : index
    %4 = vector.load %arg10[%c0_5, %c0_6] : memref<16x128xf32, #tpu.memory_space<vmem>>, vector<16x128xf32>
    %5 = vector.extract_strided_slice %4 {offsets = [0, 0], sizes = [1, 128], strides = [1, 1]} : vector<16x128xf32> to vector<1x128xf32>
    %6 = vector.extract_strided_slice %4 {offsets = [1, 0], sizes = [1, 128], strides = [1, 1]} : vector<16x128xf32> to vector<1x128xf32>
    %7 = vector.extract_strided_slice %4 {offsets = [2, 0], sizes = [1, 128], strides = [1, 1]} : vector<16x128xf32> to vector<1x128xf32>
    %8 = vector.extract_strided_slice %4 {offsets = [3, 0], sizes = [1, 128], strides = [1, 1]} : vector<16x128xf32> to vector<1x128xf32>
    %9 = vector.extract_strided_slice %4 {offsets = [4, 0], sizes = [1, 128], strides = [1, 1]} : vector<16x128xf32> to vector<1x128xf32>
    %10 = vector.extract_strided_slice %4 {offsets = [5, 0], sizes = [1, 128], strides = [1, 1]} : vector<16x128xf32> to vector<1x128xf32>
    %11 = vector.extract_strided_slice %4 {offsets = [6, 0], sizes = [1, 128], strides = [1, 1]} : vector<16x128xf32> to vector<1x128xf32>
    %12 = vector.extract_strided_slice %4 {offsets = [7, 0], sizes = [1, 128], strides = [1, 1]} : vector<16x128xf32> to vector<1x128xf32>
    %13 = vector.extract_strided_slice %4 {offsets = [8, 0], sizes = [1, 128], strides = [1, 1]} : vector<16x128xf32> to vector<1x128xf32>
    %14 = vector.extract_strided_slice %4 {offsets = [9, 0], sizes = [1, 128], strides = [1, 1]} : vector<16x128xf32> to vector<1x128xf32>
    %15 = vector.extract_strided_slice %4 {offsets = [10, 0], sizes = [1, 128], strides = [1, 1]} : vector<16x128xf32> to vector<1x128xf32>
    %c0_7 = arith.constant 0 : index
    %c0_8 = arith.constant 0 : index
    %16 = vector.load %arg9[%c0_7, %c0_8] : memref<1x128xf32, #tpu.memory_space<vmem>>, vector<1x128xf32>
    %17 = tpu.iota {dimensions = array<i32: 1>} : vector<1x128xi32>
    %c32_i32 = arith.constant 32 : i32
    %18 = vector.broadcast %c32_i32 : i32 to vector<1x128xi32>
    %19 = arith.cmpi slt, %17, %18 : vector<1x128xi32>
    %20 = arith.extui %19 : vector<1x128xi1> to vector<1x128xi32>
    %21 = arith.sitofp %20 : vector<1x128xi32> to vector<1x128xf32>
    %c0_9 = arith.constant 0 : index
    %c0_10 = arith.constant 0 : index
    %22 = vector.load %arg3[%c0_9, %c0_10] : memref<128x128xf32, #tpu.memory_space<vmem>>, vector<128x128xf32>
    %cst = arith.constant dense<0.000000e+00> : vector<8x128xf32>
    %23 = tpu.matmul %1, %22, %cst {dimension_numbers = #tpu.dot_dimension_numbers<[1], [0], [0], [1], [0, 0, 1, 1], [], []>} : vector<8x128xf32>, vector<128x128xf32>, vector<8x128xf32> -> vector<8x128xf32>
    %24 = vector.broadcast %5 : vector<1x128xf32> to vector<8x128xf32>
    %25 = arith.addf %23, %24 : vector<8x128xf32>
    %cst_11 = arith.constant 0.176776692 : f32
    %26 = vector.broadcast %cst_11 : f32 to vector<8x128xf32>
    %27 = arith.mulf %25, %26 : vector<8x128xf32>
    %cst_12 = arith.constant dense<0.000000e+00> : vector<8x8xf32>
    %28 = tpu.matmul %27, %25, %cst_12 {dimension_numbers = #tpu.dot_dimension_numbers<[1], [1], [0], [0], [0, 0, 1, 0], [], []>} : vector<8x128xf32>, vector<8x128xf32>, vector<8x8xf32> -> vector<8x8xf32>
    %cst_13 = arith.constant dense<0xFF800000> : vector<8xf32>
    %29 = vector.multi_reduction <maximumf>, %28, %cst_13 [1] : vector<8x8xf32> to vector<8xf32>
    %30 = vector.shape_cast %29 : vector<8xf32> to vector<8x1xf32>
    %31 = vector.broadcast %30 : vector<8x1xf32> to vector<8x8xf32>
    %32 = arith.subf %28, %31 : vector<8x8xf32>
    %33 = math.exp %32 : vector<8x8xf32>
    %cst_14 = arith.constant dense<0.000000e+00> : vector<8xf32>
    %34 = vector.multi_reduction <add>, %33, %cst_14 [1] : vector<8x8xf32> to vector<8xf32>
    %35 = vector.shape_cast %34 : vector<8xf32> to vector<8x1xf32>
    %36 = vector.broadcast %35 : vector<8x1xf32> to vector<8x8xf32>
    %37 = arith.divf %33, %36 : vector<8x8xf32>
    %cst_15 = arith.constant dense<0.000000e+00> : vector<8x128xf32>
    %38 = tpu.matmul %37, %25, %cst_15 {dimension_numbers = #tpu.dot_dimension_numbers<[1], [0], [0], [1], [0, 0, 1, 1], [], []>} : vector<8x8xf32>, vector<8x128xf32>, vector<8x128xf32> -> vector<8x128xf32>
    %c0_16 = arith.constant 0 : index
    %c0_17 = arith.constant 0 : index
    %39 = vector.load %arg4[%c0_16, %c0_17] : memref<128x128xf32, #tpu.memory_space<vmem>>, vector<128x128xf32>
    %cst_18 = arith.constant dense<0.000000e+00> : vector<8x128xf32>
    %40 = tpu.matmul %38, %39, %cst_18 {dimension_numbers = #tpu.dot_dimension_numbers<[1], [0], [0], [1], [0, 0, 1, 1], [], []>} : vector<8x128xf32>, vector<128x128xf32>, vector<8x128xf32> -> vector<8x128xf32>
    %41 = vector.broadcast %6 : vector<1x128xf32> to vector<8x128xf32>
    %42 = arith.addf %40, %41 : vector<8x128xf32>
    %43 = arith.addf %1, %42 : vector<8x128xf32>
    %cst_19 = arith.constant dense<0.000000e+00> : vector<8xf32>
    %44 = vector.multi_reduction <add>, %43, %cst_19 [1] : vector<8x128xf32> to vector<8xf32>
    %45 = vector.shape_cast %44 : vector<8xf32> to vector<8x1xf32>
    %cst_20 = arith.constant 3.125000e-02 : f32
    %46 = vector.broadcast %cst_20 : f32 to vector<8x1xf32>
    %47 = arith.mulf %45, %46 : vector<8x1xf32>
    %48 = vector.broadcast %47 : vector<8x1xf32> to vector<8x128xf32>
    %49 = arith.subf %43, %48 : vector<8x128xf32>
    %50 = vector.broadcast %21 : vector<1x128xf32> to vector<8x128xf32>
    %51 = arith.mulf %49, %50 : vector<8x128xf32>
    %52 = arith.mulf %51, %51 : vector<8x128xf32>
    %cst_21 = arith.constant dense<0.000000e+00> : vector<8xf32>
    %53 = vector.multi_reduction <add>, %52, %cst_21 [1] : vector<8x128xf32> to vector<8xf32>
    %54 = vector.shape_cast %53 : vector<8xf32> to vector<8x1xf32>
    %cst_22 = arith.constant 3.125000e-02 : f32
    %55 = vector.broadcast %cst_22 : f32 to vector<8x1xf32>
    %56 = arith.mulf %54, %55 : vector<8x1xf32>
    %57 = vector.broadcast %47 : vector<8x1xf32> to vector<8x128xf32>
    %58 = arith.subf %43, %57 : vector<8x128xf32>
    %cst_23 = arith.constant 9.99999974E-6 : f32
    %59 = vector.broadcast %cst_23 : f32 to vector<8x1xf32>
    %60 = arith.addf %56, %59 : vector<8x1xf32>
    %61 = math.rsqrt %60 : vector<8x1xf32>
    %62 = vector.broadcast %61 : vector<8x1xf32> to vector<8x128xf32>
    %63 = arith.mulf %58, %62 : vector<8x128xf32>
    %64 = vector.broadcast %10 : vector<1x128xf32> to vector<8x128xf32>
    %65 = arith.mulf %63, %64 : vector<8x128xf32>
    %66 = vector.broadcast %11 : vector<1x128xf32> to vector<8x128xf32>
    %67 = arith.addf %65, %66 : vector<8x128xf32>
    %c0_24 = arith.constant 0 : index
    %c0_25 = arith.constant 0 : index
    %68 = vector.load %arg5[%c0_24, %c0_25] : memref<128x128xf32, #tpu.memory_space<vmem>>, vector<128x128xf32>
    %cst_26 = arith.constant dense<0.000000e+00> : vector<8x128xf32>
    %69 = tpu.matmul %67, %68, %cst_26 {dimension_numbers = #tpu.dot_dimension_numbers<[1], [0], [0], [1], [0, 0, 1, 1], [], []>} : vector<8x128xf32>, vector<128x128xf32>, vector<8x128xf32> -> vector<8x128xf32>
    %70 = vector.broadcast %7 : vector<1x128xf32> to vector<8x128xf32>
    %71 = arith.addf %69, %70 : vector<8x128xf32>
    %c0_27 = arith.constant 0 : index
    %c0_28 = arith.constant 0 : index
    %72 = vector.load %arg5[%c0_27, %c0_28] : memref<128x128xf32, #tpu.memory_space<vmem>>, vector<128x128xf32>
    %cst_29 = arith.constant dense<0.000000e+00> : vector<8x128xf32>
    %73 = tpu.matmul %3, %72, %cst_29 {dimension_numbers = #tpu.dot_dimension_numbers<[1], [0], [0], [1], [0, 0, 1, 1], [], []>} : vector<8x128xf32>, vector<128x128xf32>, vector<8x128xf32> -> vector<8x128xf32>
    %74 = vector.broadcast %7 : vector<1x128xf32> to vector<8x128xf32>
    %75 = arith.addf %73, %74 : vector<8x128xf32>
    %cst_30 = arith.constant 0.176776692 : f32
    %76 = vector.broadcast %cst_30 : f32 to vector<8x128xf32>
    %77 = arith.mulf %71, %76 : vector<8x128xf32>
    %cst_31 = arith.constant dense<0.000000e+00> : vector<8x8xf32>
    %78 = tpu.matmul %77, %75, %cst_31 {dimension_numbers = #tpu.dot_dimension_numbers<[1], [1], [0], [0], [0, 0, 1, 0], [], []>} : vector<8x128xf32>, vector<8x128xf32>, vector<8x8xf32> -> vector<8x8xf32>
    %cst_32 = arith.constant dense<0xFF800000> : vector<8xf32>
    %79 = vector.multi_reduction <maximumf>, %78, %cst_32 [1] : vector<8x8xf32> to vector<8xf32>
    %80 = vector.shape_cast %79 : vector<8xf32> to vector<8x1xf32>
    %81 = vector.broadcast %80 : vector<8x1xf32> to vector<8x8xf32>
    %82 = arith.subf %78, %81 : vector<8x8xf32>
    %83 = math.exp %82 : vector<8x8xf32>
    %cst_33 = arith.constant dense<0.000000e+00> : vector<8xf32>
    %84 = vector.multi_reduction <add>, %83, %cst_33 [1] : vector<8x8xf32> to vector<8xf32>
    %85 = vector.shape_cast %84 : vector<8xf32> to vector<8x1xf32>
    %86 = vector.broadcast %85 : vector<8x1xf32> to vector<8x8xf32>
    %87 = arith.divf %83, %86 : vector<8x8xf32>
    %cst_34 = arith.constant dense<0.000000e+00> : vector<8x128xf32>
    %88 = tpu.matmul %87, %75, %cst_34 {dimension_numbers = #tpu.dot_dimension_numbers<[1], [0], [0], [1], [0, 0, 1, 1], [], []>} : vector<8x8xf32>, vector<8x128xf32>, vector<8x128xf32> -> vector<8x128xf32>
    %c0_35 = arith.constant 0 : index
    %c0_36 = arith.constant 0 : index
    %89 = vector.load %arg6[%c0_35, %c0_36] : memref<128x128xf32, #tpu.memory_space<vmem>>, vector<128x128xf32>
    %cst_37 = arith.constant dense<0.000000e+00> : vector<8x128xf32>
    %90 = tpu.matmul %88, %89, %cst_37 {dimension_numbers = #tpu.dot_dimension_numbers<[1], [0], [0], [1], [0, 0, 1, 1], [], []>} : vector<8x128xf32>, vector<128x128xf32>, vector<8x128xf32> -> vector<8x128xf32>
    %91 = vector.broadcast %8 : vector<1x128xf32> to vector<8x128xf32>
    %92 = arith.addf %90, %91 : vector<8x128xf32>
    %93 = arith.addf %67, %92 : vector<8x128xf32>
    %cst_38 = arith.constant dense<0.000000e+00> : vector<8xf32>
    %94 = vector.multi_reduction <add>, %93, %cst_38 [1] : vector<8x128xf32> to vector<8xf32>
    %95 = vector.shape_cast %94 : vector<8xf32> to vector<8x1xf32>
    %cst_39 = arith.constant 3.125000e-02 : f32
    %96 = vector.broadcast %cst_39 : f32 to vector<8x1xf32>
    %97 = arith.mulf %95, %96 : vector<8x1xf32>
    %98 = vector.broadcast %97 : vector<8x1xf32> to vector<8x128xf32>
    %99 = arith.subf %93, %98 : vector<8x128xf32>
    %100 = vector.broadcast %21 : vector<1x128xf32> to vector<8x128xf32>
    %101 = arith.mulf %99, %100 : vector<8x128xf32>
    %102 = arith.mulf %101, %101 : vector<8x128xf32>
    %cst_40 = arith.constant dense<0.000000e+00> : vector<8xf32>
    %103 = vector.multi_reduction <add>, %102, %cst_40 [1] : vector<8x128xf32> to vector<8xf32>
    %104 = vector.shape_cast %103 : vector<8xf32> to vector<8x1xf32>
    %cst_41 = arith.constant 3.125000e-02 : f32
    %105 = vector.broadcast %cst_41 : f32 to vector<8x1xf32>
    %106 = arith.mulf %104, %105 : vector<8x1xf32>
    %107 = vector.broadcast %97 : vector<8x1xf32> to vector<8x128xf32>
    %108 = arith.subf %93, %107 : vector<8x128xf32>
    %cst_42 = arith.constant 9.99999974E-6 : f32
    %109 = vector.broadcast %cst_42 : f32 to vector<8x1xf32>
    %110 = arith.addf %106, %109 : vector<8x1xf32>
    %111 = math.rsqrt %110 : vector<8x1xf32>
    %112 = vector.broadcast %111 : vector<8x1xf32> to vector<8x128xf32>
    %113 = arith.mulf %108, %112 : vector<8x128xf32>
    %114 = vector.broadcast %12 : vector<1x128xf32> to vector<8x128xf32>
    %115 = arith.mulf %113, %114 : vector<8x128xf32>
    %116 = vector.broadcast %13 : vector<1x128xf32> to vector<8x128xf32>
    %117 = arith.addf %115, %116 : vector<8x128xf32>
    %c0_43 = arith.constant 0 : index
    %c0_44 = arith.constant 0 : index
    %118 = vector.load %arg7[%c0_43, %c0_44] : memref<128x128xf32, #tpu.memory_space<vmem>>, vector<128x128xf32>
    %cst_45 = arith.constant dense<0.000000e+00> : vector<8x128xf32>
    %119 = tpu.matmul %117, %118, %cst_45 {dimension_numbers = #tpu.dot_dimension_numbers<[1], [0], [0], [1], [0, 0, 1, 1], [], []>} : vector<8x128xf32>, vector<128x128xf32>, vector<8x128xf32> -> vector<8x128xf32>
    %120 = vector.broadcast %16 : vector<1x128xf32> to vector<8x128xf32>
    %121 = arith.addf %119, %120 : vector<8x128xf32>
    %cst_46 = arith.constant 0.000000e+00 : f32
    %122 = vector.broadcast %cst_46 : f32 to vector<8x128xf32>
    %123 = arith.maximumf %121, %122 : vector<8x128xf32>
    %c0_47 = arith.constant 0 : index
    %c0_48 = arith.constant 0 : index
    %124 = vector.load %arg8[%c0_47, %c0_48] : memref<128x128xf32, #tpu.memory_space<vmem>>, vector<128x128xf32>
    %cst_49 = arith.constant dense<0.000000e+00> : vector<8x128xf32>
    %125 = tpu.matmul %123, %124, %cst_49 {dimension_numbers = #tpu.dot_dimension_numbers<[1], [0], [0], [1], [0, 0, 1, 1], [], []>} : vector<8x128xf32>, vector<128x128xf32>, vector<8x128xf32> -> vector<8x128xf32>
    %126 = vector.broadcast %9 : vector<1x128xf32> to vector<8x128xf32>
    %127 = arith.addf %125, %126 : vector<8x128xf32>
    %128 = arith.addf %117, %127 : vector<8x128xf32>
    %cst_50 = arith.constant dense<0.000000e+00> : vector<8xf32>
    %129 = vector.multi_reduction <add>, %128, %cst_50 [1] : vector<8x128xf32> to vector<8xf32>
    %130 = vector.shape_cast %129 : vector<8xf32> to vector<8x1xf32>
    %cst_51 = arith.constant 3.125000e-02 : f32
    %131 = vector.broadcast %cst_51 : f32 to vector<8x1xf32>
    %132 = arith.mulf %130, %131 : vector<8x1xf32>
    %133 = vector.broadcast %132 : vector<8x1xf32> to vector<8x128xf32>
    %134 = arith.subf %128, %133 : vector<8x128xf32>
    %135 = vector.broadcast %21 : vector<1x128xf32> to vector<8x128xf32>
    %136 = arith.mulf %134, %135 : vector<8x128xf32>
    %137 = arith.mulf %136, %136 : vector<8x128xf32>
    %cst_52 = arith.constant dense<0.000000e+00> : vector<8xf32>
    %138 = vector.multi_reduction <add>, %137, %cst_52 [1] : vector<8x128xf32> to vector<8xf32>
    %139 = vector.shape_cast %138 : vector<8xf32> to vector<8x1xf32>
    %cst_53 = arith.constant 3.125000e-02 : f32
    %140 = vector.broadcast %cst_53 : f32 to vector<8x1xf32>
    %141 = arith.mulf %139, %140 : vector<8x1xf32>
    %142 = vector.broadcast %132 : vector<8x1xf32> to vector<8x128xf32>
    %143 = arith.subf %128, %142 : vector<8x128xf32>
    %cst_54 = arith.constant 9.99999974E-6 : f32
    %144 = vector.broadcast %cst_54 : f32 to vector<8x1xf32>
    %145 = arith.addf %141, %144 : vector<8x1xf32>
    %146 = math.rsqrt %145 : vector<8x1xf32>
    %147 = vector.broadcast %146 : vector<8x1xf32> to vector<8x128xf32>
    %148 = arith.mulf %143, %147 : vector<8x128xf32>
    %149 = vector.broadcast %14 : vector<1x128xf32> to vector<8x128xf32>
    %150 = arith.mulf %148, %149 : vector<8x128xf32>
    %151 = vector.broadcast %15 : vector<1x128xf32> to vector<8x128xf32>
    %152 = arith.addf %150, %151 : vector<8x128xf32>
    %c0_55 = arith.constant 0 : index
    %c0_56 = arith.constant 0 : index
    %c0_57 = arith.constant 0 : index
    %153 = vector.load %arg11[%c0_55, %c0_56, %c0_57] : memref<1x8x128xf32, #tpu.memory_space<vmem>>, vector<1x8x128xf32>
    %154 = vector.shape_cast %153 : vector<1x8x128xf32> to vector<8x128xf32>
    %155 = vector.shape_cast %152 : vector<8x128xf32> to vector<1x8x128xf32>
    tpu.vector_store %arg11[%c0_55, %c0_56, %c0_57], %155 {strides = array<i32>} : memref<1x8x128xf32, #tpu.memory_space<vmem>>, vector<1x8x128xf32>,
    return
  }
  func.func @transform_0(%arg0: i32) -> (i32, i32, i32) {
    %c0_i32 = arith.constant 0 : i32
    %c0_i32_0 = arith.constant 0 : i32
    %c0_i32_1 = arith.constant 0 : i32
    return %arg0, %c0_i32, %c0_i32_0 : i32, i32, i32
  }
  func.func @transform_1(%arg0: i32) -> (i32, i32, i32) {
    %c0_i32 = arith.constant 0 : i32
    %c0_i32_0 = arith.constant 0 : i32
    %c0_i32_1 = arith.constant 0 : i32
    return %arg0, %c0_i32, %c0_i32_0 : i32, i32, i32
  }
  func.func @transform_2(%arg0: i32) -> (i32, i32) {
    %c0_i32 = arith.constant 0 : i32
    %c0_i32_0 = arith.constant 0 : i32
    %c0_i32_1 = arith.constant 0 : i32
    return %c0_i32, %c0_i32_0 : i32, i32
  }
  func.func @transform_3(%arg0: i32) -> (i32, i32) {
    %c0_i32 = arith.constant 0 : i32
    %c0_i32_0 = arith.constant 0 : i32
    %c0_i32_1 = arith.constant 0 : i32
    return %c0_i32, %c0_i32_0 : i32, i32
  }
  func.func @transform_4(%arg0: i32) -> (i32, i32) {
    %c0_i32 = arith.constant 0 : i32
    %c0_i32_0 = arith.constant 0 : i32
    %c0_i32_1 = arith.constant 0 : i32
    return %c0_i32, %c0_i32_0 : i32, i32
  }
  func.func @transform_5(%arg0: i32) -> (i32, i32) {
    %c0_i32 = arith.constant 0 : i32
    %c0_i32_0 = arith.constant 0 : i32
    %c0_i32_1 = arith.constant 0 : i32
    return %c0_i32, %c0_i32_0 : i32, i32
  }
  func.func @transform_6(%arg0: i32) -> (i32, i32) {
    %c0_i32 = arith.constant 0 : i32
    %c0_i32_0 = arith.constant 0 : i32
    %c0_i32_1 = arith.constant 0 : i32
    return %c0_i32, %c0_i32_0 : i32, i32
  }
  func.func @transform_7(%arg0: i32) -> (i32, i32) {
    %c0_i32 = arith.constant 0 : i32
    %c0_i32_0 = arith.constant 0 : i32
    %c0_i32_1 = arith.constant 0 : i32
    return %c0_i32, %c0_i32_0 : i32, i32
  }
  func.func @transform_8(%arg0: i32) -> (i32, i32) {
    %c0_i32 = arith.constant 0 : i32
    %c0_i32_0 = arith.constant 0 : i32
    %c0_i32_1 = arith.constant 0 : i32
    return %c0_i32, %c0_i32_0 : i32, i32
  }
  func.func @transform_9(%arg0: i32) -> (i32, i32) {
    %c0_i32 = arith.constant 0 : i32
    %c0_i32_0 = arith.constant 0 : i32
    %c0_i32_1 = arith.constant 0 : i32
    return %c0_i32, %c0_i32_0 : i32, i32
  }
  func.func @transform_10(%arg0: i32) -> (i32, i32, i32) {
    %c0_i32 = arith.constant 0 : i32
    %c0_i32_0 = arith.constant 0 : i32
    %c0_i32_1 = arith.constant 0 : i32
    return %arg0, %c0_i32, %c0_i32_0 : i32, i32, i32
  }
}

</mosaic_0001>

<bundles_post_ra>
// kernel: tpu_custom_call.1
= control target key start
LH: loop header
LB: loop body
LE: loop exit
PB: predicated region body
PF: predicated region fallthrough
CT: control target
= control target key end

     0   :  { %s3144_s0 = inlined_call_operand.hbm [shape: f32[2,8,128], index: 0, kind: input, shape index: {}]   ;;  %s3145_s1 = inlined_call_operand.hbm [shape: f32[2,8,128], index: 1, kind: input, shape index: {}]   ;;  %s3146_s2 = inlined_call_operand.hbm [shape: f32[128,128], index: 2, kind: input, shape index: {}]   ;;  %s3147_s3 = inlined_call_operand.hbm [shape: f32[128,128], index: 3, kind: input, shape index: {}]   ;;  %s3148_s4 = inlined_call_operand.hbm [shape: f32[128,128], index: 4, kind: input, shape index: {}]   ;;  %s3149_s5 = inlined_call_operand.hbm [shape: f32[128,128], index: 5, kind: input, shape index: {}]   ;;  %s3150_s6 = inlined_call_operand.hbm [shape: f32[128,128], index: 6, kind: input, shape index: {}]   ;;  %s3151_s7 = inlined_call_operand.hbm [shape: f32[128,128], index: 7, kind: input, shape index: {}]   ;;  %s3152_s8 = inlined_call_operand.hbm [shape: f32[1,128], index: 8, kind: input, shape index: {}]   ;;  %s3153_s9 = inlined_call_operand.vmem [shape: f32[16,128], index: 9, kind: input, shape index: {}]   ;;  %s3154_s10 = inlined_call_operand.hbm [shape: f32[2,8,128], index: 10, kind: output, shape index: {}]  }
   0x1   :  { %3159 = sst [smem:[#allocation25_spill]] %s3146_s2 }
   0x2   :  { %3160 = sst [smem:[#allocation26_spill]] %s3147_s3 }
   0x3   :  { %3161 = sst [smem:[#allocation27_spill]] %s3148_s4 }
   0x4   :  { %3162 = sst [smem:[#allocation28_spill]] %s3149_s5 }
   0x5   :  { %3163 = sst [smem:[#allocation29_spill]] %s3150_s6 }
   0x6   :  { %3164 = sst [smem:[#allocation30_spill]] %s3151_s7 }
   0x7   :  { %3165 = sst [smem:[#allocation31_spill]] %s3152_s8 }
   0x8   :  { %15 = vsyncpa [#allocation3], 0 }
   0x9   :  { %17 = vsyncpa [#allocation3 + $0x1], 0 }
   0xa   :  { %18 = vsyncpa [#allocation6], 0 }
   0xb   :  { %20 = vsyncpa [#allocation6 + $0x1], 0 }
   0xc   :  { %21 = vsyncpa [#allocation9], 0 }
   0xd   :  { %22 = vsyncpa [#allocation12], 0 }
   0xe   :  { %23 = vsyncpa [#allocation15], 0 }
   0xf   :  { %24 = vsyncpa [#allocation4], 0 }
  0x10   :  { %26 = vsyncpa [#allocation4 + $0x1], 0  ;;  %s2646_s13 = smov 0   ;;  %s2648_s14 = smov 0  }
  0x11   :  { %s2650_s15 = smov 0   ;;  %s2652_s16 = smov 0  }
  0x12 LB: > { %s2577_s17 = smov [#allocation7]   ;;  %s2667_s19 = sadd.s32 4294967295, %s2575_s16   ;;  %s2575_s16 = sphi %s2652_s16, %s3196_s16   ;;  %s2571_s15 = sphi %s2650_s15, %s3195_s15   ;;  %s2567_s14 = sphi %s2648_s14, %s3194_s14   ;;  %s2563_s13 = sphi %s2646_s13, %s3193_s13  }
  0x13   : > { %s295_s18 = sshll.u32 %s2577_s17, 4  ;;  %p1689_p0 = scmp.ge.s32.totalorder %s2575_s16, 1  ;;  %s296_s18 = int_to_ptr.vmem [resolvable:$true] %s295_s18 }
  0x14   : > { %p3155_p1 = scmp.eq.s32.totalorder %s2667_s19, 0  ;;  %p283_p2 = scmp.lt.s32.totalorder %s2575_s16, 3 }
  0x15   : > { %s2578_s21 = smov [#allocation8]   ;;  %s2579_s24 = smov [#allocation11]  }
  0x16   : > { %p2672_p3 = pnand %p1689_p0, %p283_p2  ;;  %s308_s22 = sshll.u32 %s2578_s21, 4  ;;  %s2685_s22 = int_to_ptr.vmem [resolvable:$true] %s308_s22 }
  0x17   : > { %s334_s25 = sshll.u32 %s2579_s24, 4  ;;  %s2264_s27 = scalar_lea.vmem %s296_s18, 2048  ;;  %s2687_s25 = int_to_ptr.vmem [resolvable:$true] %s334_s25 }
  0x18   : > { %s3166_s20 = scalar_select %p2672_p3, 1, 0 }
  0x19   : > { %p2147_p5 = pneg %p2672_p3  ;;  %p2265_p8 = scmp.ne.s32.totalorder %s296_s18, %s2264_s27 }
  0x1a   : > { %p2272_p11 = scmp.lt.s32.totalorder %s296_s18, %s296_s18  ;;  %p2273_p12 = scmp.lt.s32.totalorder %s2264_s27, %s2264_s27 }
  0x1b   : > { %p2681_p6 = pnand %p2147_p5, %p3155_p1 }
  0x1c   : > { %p2274_p13 = por %p2273_p12, %p2272_p11 }
  0x1d   : > { %p2691_p7 = pneg %p2681_p6 }
  0x1f   : > { %p2267_p9 = pnand %p2265_p8, %p2691_p7 }
  0x21   : > { %p2268_p10 = pneg %p2267_p9 }
  0x23   : > { %p2275_p0 = pnand %p2274_p13, %p2268_p10 }
  0x25   : > { %2278 = shalt.err (!%p2275_p0)
}
  0x26   : > { %s2580_s28 = smov 128   ;;  %s2581_s29 = smov 8  }
  0x27   : > { %s3169_s2 = sld [smem:[#allocation25_spill]]  ;;  %s2290_s12 = scalar_lea.vmem %s2685_s22, 2048 }
  0x28   : > { %p2291_p2 = scmp.ne.s32.totalorder %s2685_s22, %s2290_s12  ;;  %p2298_p9 = scmp.lt.s32.totalorder %s2685_s22, %s2685_s22 }
  0x29   : > { %p2299_p10 = scmp.lt.s32.totalorder %s2290_s12, %s2290_s12 }
  0x2a   : > { %p2293_p5 = pnand %p2291_p2, %p2691_p7 }
  0x2b   : > { %p2300_p11 = por %p2299_p10, %p2298_p9 }
  0x2c   : > { %p2294_p8 = pneg %p2293_p5 }
  0x2d   : > { %2150 = dma.hbm_to_vmem [thread:$0]  (!%p2681_p6), %s3169_s2, 2048, %s296_s18, [#allocation6], %s2580_s28, %s2580_s28, %s2581_s29  }
  0x2e   : > { %p2301_p12 = pnand %p2300_p11, %p2294_p8 }
  0x30   : > { %2304 = shalt.err (!%p2301_p12)
}
  0x31   : > { %s3170_s3 = sld [smem:[#allocation26_spill]]  ;;  %s2316_s18 = scalar_lea.vmem %s2687_s25, 2048 }
  0x32   : > { %p2317_p13 = scmp.ne.s32.totalorder %s2687_s25, %s2316_s18  ;;  %p2324_p5 = scmp.lt.s32.totalorder %s2687_s25, %s2687_s25 }
  0x33   : > { %p2325_p8 = scmp.lt.s32.totalorder %s2316_s18, %s2316_s18 }
  0x34   : > { %p2319_p0 = pnand %p2317_p13, %p2691_p7 }
  0x35   : > { %p2326_p9 = por %p2325_p8, %p2324_p5 }
  0x36   : > { %p2320_p2 = pneg %p2319_p0 }
  0x37   : > { %2153 = dma.hbm_to_vmem [thread:$0]  (!%p2681_p6), %s3170_s3, 2048, %s2685_s22, [#allocation9], %s2580_s28, %s2580_s28, %s2581_s29  }
  0x38   : > { %p2327_p10 = pnand %p2326_p9, %p2320_p2 }
  0x3a   : > { %2330 = shalt.err (!%p2327_p10)
}
  0x3b   : > { %s3171_s5 = sld [smem:[#allocation28_spill]]  ;;  %s2582_s22 = smov [#allocation14]  }
  0x3c   : > { %s360_s30 = sshll.u32 %s2582_s22, 4  ;;  %s2583_s11 = smov [#allocation10]   ;;  %s361_s30 = int_to_ptr.vmem [resolvable:$true] %s360_s30 }
  0x3d   : > { %s321_s12 = sshll.u32 %s2583_s11, 4  ;;  %s2342_s17 = scalar_lea.vmem %s361_s30, 2048  ;;  %s322_s12 = int_to_ptr.vmem [resolvable:$true] %s321_s12 }
  0x3e   : > { %p2343_p11 = scmp.ne.s32.totalorder %s361_s30, %s2342_s17  ;;  %p2350_p0 = scmp.lt.s32.totalorder %s361_s30, %s361_s30 }
  0x3f   : > { %p2351_p2 = scmp.lt.s32.totalorder %s2342_s17, %s2342_s17 }
  0x40   : > { %p2345_p12 = pnand %p2343_p11, %p2691_p7 }
  0x41   : > { %2159 = dma.hbm_to_vmem [thread:$0]  (!%p2681_p6), %s3171_s5, 2048, %s2687_s25, [#allocation12], %s2580_s28, %s2580_s28, %s2581_s29  }
  0x42   : > { %p2346_p13 = pneg %p2345_p12  ;;  %p2352_p5 = por %p2351_p2, %p2350_p0 }
  0x44   : > { %p2353_p8 = pnand %p2352_p5, %p2346_p13 }
  0x46   : > { %2356 = shalt.err (!%p2353_p8)
}
  0x47   : > { %s3172_s7 = sld [smem:[#allocation30_spill]]  ;;  %s2368_s18 = scalar_lea.vmem %s322_s12, 2048 }
  0x48   : > { %p2369_p9 = scmp.ne.s32.totalorder %s322_s12, %s2368_s18  ;;  %p2376_p12 = scmp.lt.s32.totalorder %s322_s12, %s322_s12 }
  0x49   : > { %p2377_p0 = scmp.lt.s32.totalorder %s2368_s18, %s2368_s18 }
  0x4a   : > { %p2371_p10 = pnand %p2369_p9, %p2691_p7 }
  0x4b   : > { %p2378_p13 = por %p2377_p0, %p2376_p12 }
  0x4c   : > { %p2372_p11 = pneg %p2371_p10 }
  0x4d   : > { %2165 = dma.hbm_to_vmem [thread:$0]  (!%p2681_p6), %s3172_s7, 2048, %s361_s30, [#allocation15], %s2580_s28, %s2580_s28, %s2581_s29  }
  0x4e   : > { %p2379_p2 = pnand %p2378_p13, %p2372_p11 }
  0x50   : > { %2382 = shalt.err (!%p2379_p2)
}
  0x51   : > { %s3173_s4 = sld [smem:[#allocation27_spill]]  ;;  %s2584_s22 = smov [#allocation13]  }
  0x52   : > { %s347_s30 = sshll.u32 %s2584_s22, 4  ;;  %s2585_s11 = smov [#allocation16]   ;;  %s348_s30 = int_to_ptr.vmem [resolvable:$true] %s347_s30 }
  0x53   : > { %s374_s17 = sshll.u32 %s2585_s11, 4  ;;  %s2394_s25 = scalar_lea.vmem %s348_s30, 2048  ;;  %s375_s17 = int_to_ptr.vmem [resolvable:$true] %s374_s17 }
  0x54   : > { %p2395_p5 = scmp.ne.s32.totalorder %s348_s30, %s2394_s25  ;;  %p2402_p10 = scmp.lt.s32.totalorder %s348_s30, %s348_s30 }
  0x55   : > { %p2403_p11 = scmp.lt.s32.totalorder %s2394_s25, %s2394_s25 }
  0x56   : > { %p2397_p8 = pnand %p2395_p5, %p2691_p7 }
  0x57   : > { %2156 = dma.hbm_to_vmem [thread:$0]  (!%p2681_p6), %s3173_s4, 2048, %s322_s12, [#allocation9], %s2580_s28, %s2580_s28, %s2581_s29  }
  0x58   : > { %p2398_p9 = pneg %p2397_p8  ;;  %p2404_p12 = por %p2403_p11, %p2402_p10 }
  0x5a   : > { %p2405_p0 = pnand %p2404_p12, %p2398_p9 }
  0x5c   : > { %2408 = shalt.err (!%p2405_p0)
}
  0x5d   : > { %s3174_s6 = sld [smem:[#allocation29_spill]]  ;;  %s2420_s18 = scalar_lea.vmem %s375_s17, 16 }
  0x5e   : > { %p2421_p13 = scmp.ne.s32.totalorder %s375_s17, %s2420_s18  ;;  %s2427_s24 = scalar_lea.vmem %s375_s17, 32 }
  0x5f   : > { %p2428_p8 = scmp.lt.s32.totalorder %s375_s17, %s375_s17  ;;  %p2429_p9 = scmp.lt.s32.totalorder %s2427_s24, %s2420_s18 }
  0x60   : > { %p2423_p2 = pnand %p2421_p13, %p2691_p7 }
  0x61   : > { %p2430_p10 = por %p2429_p9, %p2428_p8 }
  0x62   : > { %p2424_p5 = pneg %p2423_p2 }
  0x63   : > { %2162 = dma.hbm_to_vmem [thread:$0]  (!%p2681_p6), %s3174_s6, 2048, %s348_s30, [#allocation12], %s2580_s28, %s2580_s28, %s2581_s29  }
  0x64   : > { %p2431_p11 = pnand %p2430_p10, %p2424_p5 }
  0x66   : > { %2434 = shalt.err (!%p2431_p11)
}
  0x67   : > { %s3175_s8 = sld [smem:[#allocation31_spill]]  ;;  %s1688_s26 = sadd.s32 4294967294, %s2575_s16  }
  0x68   : > { %s2774_s23 = sadd.s32 1, %s2575_s16   ;;  %s39_s28 = sadd.s32 1, %s2571_s15 }
  0x69   : > { %s36_s29 = ssub.s32 %s2575_s16, %s2774_s23  ;;  %p46_p7 = scmp.ne.s32.totalorder %s2571_s15, %s2567_s14 }
  0x6a   : > { %p37_p12 = scmp.eq.s32.totalorder %s36_s29, 0  ;;  %p47_p0 = scmp.eq.s32.totalorder %s2575_s16, 0 }
  0x6b   : > { %p52_p13 = scmp.ne.s32.totalorder %s2567_s14, %s2563_s13  ;;  %p270_p2 = scmp.eq.s32.totalorder %s2667_s19, 1 }
  0x6c   : > { %s2786_s30 = scalar_select %p37_p12, %s2571_s15, %s39_s28  }
  0x6d   : > { %2168 = dma.hbm_to_vmem [thread:$0]  (!%p2681_p6), %s3175_s8, 16, %s375_s17, [#allocation15]  }
  0x6e   : > { %p48_p5 = por %p47_p0, %p46_p7  ;;  %p2790_p8 = por %p3155_p1, %p52_p13 }
  0x6f   : > { %p2794_p6 = por %p270_p2, %p46_p7  ;;  %p276_p9 = scmp.eq.s32.totalorder %s1688_s26, 1 }
  0x70   : > { %s3176_s11 = scalar_select %p2790_p8, 1, 0 }
  0x71   : > { %s3177_s17 = scalar_select %p2794_p6, 1, 0 }
  0x72   : > { %p2187_p10 = scmp.lt.s32.totalorder %s2575_s16, 2  ;;  %s388_s25 = sand.u32 1, %s2571_s15  }
  0x73   : > { %p2800_p11 = por %p276_p9, %p52_p13  ;;  %s2804_s21 = sshll.u32 %s388_s25, 3 }
  0x74   : > { %s1699_s18 = sshll.u32 %s2575_s16, 7  ;;  %s392_s28 = scalar_lea.vmem [#allocation2], %s2804_s21 }
  0x75   : > { %s3178_s12 = scalar_select %p2800_p11, 1, 0 }
  0x76   : > { %s2810_s22 = scalar_lea.hbm %s3144_s0, %s1699_s18  ;;  %s399_s26 = sshll.u32 %s392_s28, 4  ;;  %s400_s26 = int_to_ptr.vmem [resolvable:$true] %s399_s26 }
  0x77   : > { %p2813_p7 = pnand %p2187_p10, %p48_p5  ;;  %s2820_s4 = scalar_lea.hbm %s3145_s1, %s1699_s18 }
  0x78   : > { %s389_s24 = scalar_lea.sflag [#allocation3], %s388_s25  ;;  %s2435_s27 = scalar_lea.hbm %s2810_s22, 128 }
  0x79   : > { %p2436_p12 = scmp.ne.s32.totalorder %s2810_s22, %s2435_s27  ;;  %p2437_p0 = pneg %p2813_p7 }
  0x7a   : > { %s2440_s6 = scalar_lea.hbm %s3144_s0, 256  ;;  %p2441_p5 = scmp.lt.s32.totalorder %s2810_s22, %s3144_s0 }
  0x7b   : > { %p2438_p13 = pnand %p2437_p0, %p2436_p12  ;;  %p2442_p9 = scmp.lt.s32.totalorder %s2440_s6, %s2435_s27 }
  0x7d   : > { %p2439_p2 = pneg %p2438_p13  ;;  %p2443_p10 = por %p2442_p9, %p2441_p5 }
  0x7f   : > { %p2444_p4 = pnand %p2443_p10, %p2439_p2 }
  0x81   : > { %2447 = shalt.err (!%p2444_p4)
}
  0x82   : > { %s2448_s2 = scalar_lea.vmem %s400_s26, 128  ;;  %s2586_s3 = smov [#allocation2]  }
  0x83   : > { %p2449_p1 = scmp.ne.s32.totalorder %s400_s26, %s2448_s2  ;;  %s2453_s25 = sshll.u32 %s2586_s3, 4  ;;  %s2454_s25 = int_to_ptr.vmem [resolvable:$false] %s2453_s25 }
  0x84   : > { %s2455_s5 = scalar_lea.vmem %s2454_s25, 256  ;;  %p2456_p13 = scmp.lt.s32.totalorder %s400_s26, %s2454_s25 }
  0x85   : > { %p2451_p11 = pnand %p2449_p1, %p2437_p0  ;;  %p2457_p6 = scmp.lt.s32.totalorder %s2455_s5, %s2448_s2 }
  0x87   : > { %p2452_p12 = pneg %p2451_p11  ;;  %p2458_p8 = por %p2457_p6, %p2456_p13 }
  0x89   : > { %p2459_p3 = pnand %p2458_p8, %p2452_p12 }
  0x8b   : > { %2462 = shalt.err (!%p2459_p3)
}
  0x8c   : > { %2172 = dma.hbm_to_vmem [thread:$0]  (!%p2813_p7), %s2810_s22, 128, %s400_s26, %s389_s24  }
  0x8d   : > { %s406_s6 = sand.u32 1, %s2575_s16   ;;  %s410_s7 = scalar_lea.vmem [#allocation5], %s2804_s21 }
  0x8e   : > { %s417_s8 = sshll.u32 %s410_s7, 4  ;;  %s407_s18 = scalar_lea.sflag [#allocation6], %s406_s6  ;;  %s418_s8 = int_to_ptr.vmem [resolvable:$true] %s417_s8 }
  0x8f   : > { %s2463_s27 = scalar_lea.hbm %s2820_s4, 128  ;;  %s2468_s3 = scalar_lea.hbm %s3145_s1, 256 }
  0x90   : > { %p2464_p1 = scmp.ne.s32.totalorder %s2820_s4, %s2463_s27  ;;  %p2469_p8 = scmp.lt.s32.totalorder %s2820_s4, %s3145_s1 }
  0x91   : > { %p2470_p6 = scmp.lt.s32.totalorder %s2468_s3, %s2463_s27 }
  0x92   : > { %p2466_p3 = pnand %p2464_p1, %p2437_p0 }
  0x93   : > { %p2471_p11 = por %p2470_p6, %p2469_p8 }
  0x94   : > { %p2467_p4 = pneg %p2466_p3 }
  0x96   : > { %p2472_p2 = pnand %p2471_p11, %p2467_p4 }
  0x98   : > { %2475 = shalt.err (!%p2472_p2)
}
  0x99   : > { %s2476_s21 = scalar_lea.vmem %s418_s8, 128  ;;  %s2587_s22 = smov [#allocation5]  }
  0x9a   : > { %p2477_p5 = scmp.ne.s32.totalorder %s418_s8, %s2476_s21  ;;  %s2481_s26 = sshll.u32 %s2587_s22, 4  ;;  %s2482_s26 = int_to_ptr.vmem [resolvable:$false] %s2481_s26 }
  0x9b   : > { %s2483_s24 = scalar_lea.vmem %s2482_s26, 256  ;;  %p2484_p12 = scmp.lt.s32.totalorder %s418_s8, %s2482_s26 }
  0x9c   : > { %p2479_p9 = pnand %p2477_p5, %p2437_p0  ;;  %p2485_p13 = scmp.lt.s32.totalorder %s2483_s24, %s2476_s21 }
  0x9e   : > { %p2480_p10 = pneg %p2479_p9  ;;  %p2486_p1 = por %p2485_p13, %p2484_p12 }
  0xa0   : > { %p2487_p3 = pnand %p2486_p1, %p2480_p10 }
  0xa2   : > { %2490 = shalt.err (!%p2487_p3)
}
  0xa3   : > { %2175 = dma.hbm_to_vmem [thread:$0]  (!%p2813_p7), %s2820_s4, 128, %s418_s8, %s407_s18  }
  0xa4   : > { %p3180_p4 = scmp.ne.s32.totalorder %s3166_s20, 0 }
  0xa5   : > { %s2865_s6 = sand.u32 (!%p3180_p4), 1, %s2567_s14   ;;  %p3181_p0 = scmp.ne.s32.totalorder (!%p3180_p4), %s3176_s11, 0 }
  0xa6   : > { %426 = sbr.rel (%p3180_p4) target bundleno = 3737 (0xe99), region = 60  ;;  %s2868_s7 = sshll.u32 (!%p3180_p4), %s2865_s6, 3 }
  0xa7   : > { %s429_s27 = scalar_lea.sflag (!%p3180_p4), [#allocation3], %s2865_s6  ;;  %s432_s28 = scalar_lea.vmem (!%p3180_p4), [#allocation2], %s2868_s7 }
  0xab   : > { %2534 = dma.done.wait (%p3181_p0), %s429_s27, 128  }
  0xac   : > { %2536 = vsyncadd (%p3181_p0), %s429_s27, 4294967168  ;;  %s437_s4 = sand.u32 1, %s2667_s19   ;;  %s441_s29 = scalar_lea.vmem [#allocation5], %s2868_s7 }
  0xad   : > { %s438_s20 = scalar_lea.sflag [#allocation6], %s437_s4 }
  0xae   : > { %2538 = dma.done.wait (%p3181_p0), %s438_s20, 128  }
  0xaf   : > { %2540 = vsyncadd (%p3181_p0), %s438_s20, 4294967168  ;;  %p3182_p7 = scmp.eq.s32.totalorder %s2667_s19, 0 }
  0xb1   : > { %2542 = dma.done.wait (%p3182_p7), [#allocation6], 2048   ;;  %p3183_p8 = pmov %p3182_p7 }
  0xb2   : > { %p3184_p6 = pmov %p3182_p7 }
  0xb3   : > { %2544 = vsyncadd (%p3183_p8), [#allocation6], 4294965248 }
  0xb4   : > { %2546 = dma.done.wait (%p3184_p6), [#allocation9], 4096   ;;  %p3185_p11 = pmov %p3184_p6 }
  0xb5   : > { %p3186_p2 = pmov %p3184_p6 }
  0xb6   : > { %2548 = vsyncadd (%p3185_p11), [#allocation9], 4294963200 }
  0xb7   : > { %2550 = dma.done.wait (%p3186_p2), [#allocation12], 4096   ;;  %p3187_p5 = pmov %p3186_p2 }
  0xb8   : > { %p3188_p9 = pmov %p3186_p2 }
  0xb9   : > { %2552 = vsyncadd (%p3187_p5), [#allocation12], 4294963200 }
  0xba   : > { %2554 = dma.done.wait (%p3188_p9), [#allocation15], 2064   ;;  %p3189_p10 = pmov %p3186_p2 }
  0xbb   : > { %v2588_v0 = vmov 0.0   ;;  %vm2589_vm0 = vmmov 0   ;;  %v536_v1 = vld [vmem:[#allocation7 + $0x78] sm:$0xff]  ;;  %v535_v2 = vld [vmem:[#allocation7 + $0x70] sm:$0xff]  ;;  %v534_v3 = vld [vmem:[#allocation7 + $0x68] sm:$0xff]  ;;  %v516_v18 = vlaneseq  ;;  %vm682_vm1 = vcmask 64512  }
  0xbc   : > { %2556 = vsyncadd (%p3189_p10), [#allocation15], 4294965232  ;;  %1848 = vmatprep.subr.mxu0 %v2588_v0  ;;  %1880 = vmatprep.mubr.msk.f32.mxu0 %vm2589_vm0, %v2588_v0  ;;  %v533_v4 = vld [vmem:[#allocation7 + $0x60] sm:$0xff]  ;;  %v532_v5 = vld [vmem:[#allocation7 + $0x58] sm:$0xff]  ;;  %s1718_s3 = sshll.u32 %s2667_s19, 7  ;;  %s510_s25 = scalar_lea.vmem [#allocation17], %s2868_s7 }
  0xbd   : > { %1883 = vmatprep.subr.mxu1 %v2588_v0  ;;  %1885 = vmatprep.mubr.msk.f32.mxu1 %vm2589_vm0, %v2588_v0  ;;  %v531_v6 = vld [vmem:[#allocation7 + $0x50] sm:$0xff]  ;;  %v530_v7 = vld [vmem:[#allocation7 + $0x48] sm:$0xff]  ;;  %v529_v8 = vld [vmem:[#allocation7 + $0x40] sm:$0xff]  ;;  %v2928_v19 = vshrl.u32 %v516_v18, 7  ;;  %s1529_s5 = sshll.u32 %s510_s25, 4  ;;  %s1527_s26 = scalar_lea.hbm %s3154_s10, %s1718_s3  ;;  %s1530_s5 = int_to_ptr.vmem [resolvable:$true] %s1529_s5 }
  0xbe   : > { %1849 = vmatpush3.msra.mxu0 %v536_v1  ;;  %v528_v9 = vld [vmem:[#allocation7 + $0x38] sm:$0xff]  ;;  %v527_v10 = vld [vmem:[#allocation7 + $0x30] sm:$0xff]  ;;  %v526_v11 = vld [vmem:[#allocation7 + $0x28] sm:$0xff]  ;;  %s1516_s24 = scalar_lea.sflag [#allocation4], %s2865_s6  ;;  %s2491_s27 = scalar_lea.vmem %s1530_s5, 128 }
  0xbf   : > { %1850 = vmatprep.subr.mxu0 %v2588_v0  ;;  %v525_v12 = vld [vmem:[#allocation7 + $0x20] sm:$0xff]  ;;  %v524_v13 = vld [vmem:[#allocation7 + $0x18] sm:$0xff]  ;;  %v523_v14 = vld [vmem:[#allocation7 + $0x10] sm:$0xff]  ;;  %v539_v20 = vsub.s32 0, %v2928_v19  ;;  %v785_v56 = vsub.s32 1, %v2928_v19  ;;  %p2492_p12 = scmp.ne.s32.totalorder %s1530_s5, %s2491_s27  ;;  %p3190_p13 = scmp.ne.s32.totalorder %s3177_s17, 0 }
  0xc0   : > { %1851 = vmatpush3.msra.mxu0 %v535_v2  ;;  %v522_v15 = vld [vmem:[#allocation7 + $0x8] sm:$0xff]  ;;  %v521_v16 = vld [vmem:[#allocation7] sm:$0xff]  ;;  %v782_v38 = vld [vmem:[#allocation8 + $0x78] sm:$0xff] }
  0xc1   : > { %1852 = vmatprep.subr.mxu0 %v2588_v0  ;;  %v2920_v17 = vld [vmem:[%s432_s28] sm:$0xff]  ;;  %v781_v39 = vld [vmem:[#allocation8 + $0x70] sm:$0xff]  ;;  %v778_v42 = vld [vmem:[#allocation8 + $0x58] sm:$0xff]  ;;  %p2493_p1 = pnand %p2492_p12, %p3190_p13  ;;  %s2590_s28 = smov [#allocation17]  }
  0xc2   : > { %1853 = vmatpush3.msra.mxu0 %v534_v3  ;;  %v2934_v21 = vld [vmem:[%s3153_s9] sm:$0xff]  ;;  %v780_v40 = vld [vmem:[#allocation8 + $0x68] sm:$0xff]  ;;  %v777_v43 = vld [vmem:[#allocation8 + $0x50] sm:$0xff]  ;;  %s2495_s4 = sshll.u32 %s2590_s28, 4  ;;  %s2496_s4 = int_to_ptr.vmem [resolvable:$false] %s2495_s4 }
  0xc3   : > { %1854 = vmatprep.subr.mxu0 %v2588_v0  ;;  %v540_v22 = vrot.slane %v2934_v21, %v539_v20  ;;  %v779_v41 = vld [vmem:[#allocation8 + $0x60] sm:$0xff]  ;;  %v776_v44 = vld [vmem:[#allocation8 + $0x48] sm:$0xff]  ;;  %v774_v46 = vld [vmem:[#allocation8 + $0x38] sm:$0xff]  ;;  %v786_v57 = vrot.slane %v2934_v21, %v785_v56  ;;  %p2494_p3 = pneg %p2493_p1  ;;  %s2497_s19 = scalar_lea.vmem %s2496_s4, 256 }
  0xc4   : > { %1855 = vmatpush3.msra.mxu0 %v533_v4  ;;  %v775_v45 = vld [vmem:[#allocation8 + $0x40] sm:$0xff]  ;;  %v773_v47 = vld [vmem:[#allocation8 + $0x30] sm:$0xff]  ;;  %v772_v48 = vld [vmem:[#allocation8 + $0x28] sm:$0xff]  ;;  %p2498_p4 = scmp.lt.s32.totalorder %s1530_s5, %s2496_s4  ;;  %p2499_p0 = scmp.lt.s32.totalorder %s2497_s19, %s2491_s27 }
  0xc5   : > { %1856 = vmatprep.subr.mxu0 %v2588_v0  ;;  %v771_v49 = vld [vmem:[#allocation8 + $0x20] sm:$0xff]  ;;  %v770_v50 = vld [vmem:[#allocation8 + $0x18] sm:$0xff]  ;;  %v769_v51 = vld [vmem:[#allocation8 + $0x10] sm:$0xff] }
  0xc6   : > { %1857 = vmatpush3.msra.mxu0 %v532_v5  ;;  %v768_v52 = vld [vmem:[#allocation8 + $0x8] sm:$0xff]  ;;  %v767_v53 = vld [vmem:[#allocation8] sm:$0xff]  ;;  %v895_v62 = vld [vmem:[#allocation10 + $0x78] sm:$0xff]  ;;  %v517_v5 = vand.u32 127, %v516_v18  ;;  %p2500_p7 = por %p2499_p0, %p2498_p4 }
  0xc7   : > { %1858 = vmatprep.subr.mxu0 %v2588_v0  ;;  %v894_v63 = vld [vmem:[#allocation10 + $0x70] sm:$0xff]  ;;  %v893_v1 = vld [vmem:[#allocation10 + $0x68] sm:$0xff]  ;;  %v892_v2 = vld [vmem:[#allocation10 + $0x60] sm:$0xff] }
  0xc8   : > { %1859 = vmatpush3.msra.mxu0 %v531_v6  ;;  %v891_v3 = vld [vmem:[#allocation10 + $0x58] sm:$0xff]  ;;  %v890_v4 = vld [vmem:[#allocation10 + $0x50] sm:$0xff]  ;;  %vm518_vm2 = vcmp.lt.s32.totalorder %v517_v5, 32  ;;  %p2501_p8 = pnand %p2500_p7, %p2494_p3 }
  0xc9   : > { %1860 = vmatprep.subr.mxu0 %v2588_v0  ;;  %v883_v18 = vld [vmem:[#allocation10 + $0x18] sm:$0xff]  ;;  %v1197_v5 = vld [vmem:[#allocation11 + $0x10] sm:$0xff] }
  0xca   : > { %1861 = vmatpush3.msra.mxu0 %v530_v7 }
  0xcb   : > { %1862 = vmatprep.subr.mxu0 %v2588_v0 }
  0xcc   : > { %1863 = vmatpush3.msra.mxu0 %v529_v8  ;;  %v2985_v8 = vsel %vm518_vm2, 1.0, %v2588_v0 }
  0xcd   : > { %1864 = vmatprep.subr.mxu0 %v2588_v0 }
  0xce   : > { %1865 = vmatpush3.msra.mxu0 %v528_v9 }
  0xcf   : > { %1866 = vmatprep.subr.mxu0 %v2588_v0 }
  0xd0   : > { %1867 = vmatpush3.msra.mxu0 %v527_v10 }
  0xd1   : > { %1868 = vmatprep.subr.mxu0 %v2588_v0 }
  0xd2   : > { %1869 = vmatpush3.msra.mxu0 %v526_v11 }
  0xd3   : > { %1870 = vmatprep.subr.mxu0 %v2588_v0 }
  0xd4   : > { %1871 = vmatpush3.msra.mxu0 %v525_v12  ;;  %v889_v12 = vld [vmem:[#allocation10 + $0x48] sm:$0xff] }
  0xd5   : > { %1872 = vmatprep.subr.mxu0 %v2588_v0 }
  0xd6   : > { %1873 = vmatpush3.msra.mxu0 %v524_v13  ;;  %v888_v13 = vld [vmem:[#allocation10 + $0x40] sm:$0xff] }
  0xd7   : > { %1874 = vmatprep.subr.mxu0 %v2588_v0 }
  0xd8   : > { %1875 = vmatpush3.msra.mxu0 %v523_v14  ;;  %v887_v14 = vld [vmem:[#allocation10 + $0x38] sm:$0xff] }
  0xd9   : > { %1876 = vmatprep.subr.mxu0 %v2588_v0 }
  0xda   : > { %1877 = vmatpush3.msra.mxu0 %v522_v15  ;;  %v886_v15 = vld [vmem:[#allocation10 + $0x30] sm:$0xff] }
  0xdb   : > { %1878 = vmatprep.subr.mxu0 %v2588_v0 }
  0xdc   : > { %1879 = vmatpush3.msra.mxu0 %v521_v16  ;;  %v885_v16 = vld [vmem:[#allocation10 + $0x28] sm:$0xff] }
  0xdd   : > { %1881 = vmatmul.mubr.f32.vlgmr.msra.gmra.mxu0 %v2920_v17  ;;  %1928 = vmatprep.subr.mxu0 %v2588_v0 }
  0xde   : > { %1960 = vmatprep.mubr.msk.f32.mxu0 %vm2589_vm0, %v2588_v0  ;;  %1929 = vmatpush3.msra.mxu0 %v895_v62 }
  0xdf   : > { %1930 = vmatprep.subr.mxu0 %v2588_v0 }
  0xe0   : > { %1931 = vmatpush3.msra.mxu0 %v894_v63 }
  0xe1   : > { %1932 = vmatprep.subr.mxu0 %v2588_v0 }
  0xe2   : > { %1933 = vmatpush3.msra.mxu0 %v893_v1 }
  0xe3   : > { %1934 = vmatprep.subr.mxu0 %v2588_v0 }
  0xe4   : > { %1935 = vmatpush3.msra.mxu0 %v892_v2 }
  0xe5   : > { %1936 = vmatprep.subr.mxu0 %v2588_v0 }
  0xe6   : > { %1937 = vmatpush3.msra.mxu0 %v891_v3 }
  0xe7   : > { %1938 = vmatprep.subr.mxu0 %v2588_v0 }
  0xe8   : > { %1939 = vmatpush3.msra.mxu0 %v890_v4 }
  0xe9   : > { %1940 = vmatprep.subr.mxu0 %v2588_v0 }
  0xea   : > { %1941 = vmatpush3.msra.mxu0 %v889_v12 }
  0xeb   : > { %1942 = vmatprep.subr.mxu0 %v2588_v0 }
  0xec   : > { %1943 = vmatpush3.msra.mxu0 %v888_v13 }
  0xed   : > { %1944 = vmatprep.subr.mxu0 %v2588_v0 }
  0xee   : > { %1945 = vmatpush3.msra.mxu0 %v887_v14 }
  0xef   : > { %1946 = vmatprep.subr.mxu0 %v2588_v0 }
  0xf0   : > { %1947 = vmatpush3.msra.mxu0 %v886_v15 }
  0xf1   : > { %1948 = vmatprep.subr.mxu0 %v2588_v0 }
  0xf2   : > { %1949 = vmatpush3.msra.mxu0 %v885_v16 }
  0xf3   : > { %1950 = vmatprep.subr.mxu0 %v2588_v0 }
 0x19d   : > { %v607_v23 = vpop.f32.mrf.mxu0 }
 0x19e   : > { %v608_v24 = vadd.f32 %v607_v23, %v540_v22  ;;  %v882_v22 = vld [vmem:[#allocation10 + $0x10] sm:$0xff]  ;;  %v881_v23 = vld [vmem:[#allocation10 + $0x8] sm:$0xff] }
 0x19f   : > { %v1882_v25 = vpop.f32.mrf.mxu0 }
 0x1a0   : > { %1884 = vmatpush3.xpose.msra.mxu1 %v608_v24  ;;  %v611_v26 = vmul.f32 0.17677669, %v608_v24  ;;  %v512_v25 = vld [vmem:[%s441_s29] sm:$0xff] }
 0x1a1   : > { %1888 = vmatprep.subr.mxu1 %v2588_v0 }
 0x1a3   : > { %1886 = vmatmul.mubr.f32.vlgmr.msra.gmra.mxu1 %v611_v26 }
 0x1a4   : > { %1889 = vmatpush3.msra.mxu1 %v608_v24  ;;  %1890 = vmatprep.mubr.msk.f32.mxu1 %vm2589_vm0, %v2588_v0  ;;  %v880_v24 = vld [vmem:[#allocation10] sm:$0xff] }
 0x1a5   : > { %1893 = vmatprep.subr.mxu1 %v2588_v0 }
 0x263   : > { %v678_v27 = vpop.f32.mrf.mxu1 }
 0x264   : > { %v683_v28 = vsel %vm682_vm1, %v678_v27, -inf }
 0x265   : > { %684 = vmax.xlane.f32.xlu0 %v683_v28  ;;  %v1887_v29 = vpop.f32.mrf.mxu1 }
 0x266   : > { %v872_v29 = vsub.s32 5, %v2928_v19 }
 0x2ee   : > { %v685_v30 = vpop.xlane.xlu0 %684 }
 0x2ef   : > { %v686_v31 = vsub.f32 %v678_v27, %v685_v30  ;;  %v877_v30 = vsub.s32 6, %v2928_v19 }
 0x2f1   : > { %v687_v32 = vmul.f32 1.442695, %v686_v31  ;;  %v873_v31 = vrot.slane %v2934_v21, %v872_v29 }
 0x2f3   : > { %2239 = vpow2.f32 %v687_v32 }
 0x300   : > { %v2240_v33 = vpop.eup %2239 }
 0x301   : > { %v689_v34 = vsel %vm682_vm1, %v2240_v33, 0.0 }
 0x302   : > { %690 = vadd.xlane.f32.xlu0 %v689_v34  ;;  %v878_v34 = vrot.slane %v2934_v21, %v877_v30 }
 0x38b   : > { %v691_v35 = vpop.xlane.xlu0 %690 }
 0x38c   : > { %2241 = vrcp.f32 %v691_v35 }
 0x399   : > { %v2242_v36 = vpop.eup %2241 }
 0x39a   : > { %v693_v37 = vmul.f32 %v2242_v36, %v2240_v33 }
 0x39c   : > { %1891 = vmatmul.mubr.msk.f32.vlgmr.msra.gmra.mxu1 %vm682_vm1, %v693_v37  ;;  %v898_v37 = vsub.s32 2, %v2928_v19 }
 0x39d   : > { %1894 = vmatpush3.msra.mxu1 %v782_v38  ;;  %1925 = vmatprep.mubr.msk.f32.mxu1 %vm2589_vm0, %v2588_v0 }
 0x39e   : > { %1895 = vmatprep.subr.mxu1 %v2588_v0  ;;  %v899_v38 = vrot.slane %v2934_v21, %v898_v37 }
 0x39f   : > { %1896 = vmatpush3.msra.mxu1 %v781_v39 }
 0x3a0   : > { %1897 = vmatprep.subr.mxu1 %v2588_v0 }
 0x3a1   : > { %1898 = vmatpush3.msra.mxu1 %v780_v40 }
 0x3a2   : > { %1899 = vmatprep.subr.mxu1 %v2588_v0 }
 0x3a3   : > { %1900 = vmatpush3.msra.mxu1 %v779_v41 }
 0x3a4   : > { %1901 = vmatprep.subr.mxu1 %v2588_v0 }
 0x3a5   : > { %1902 = vmatpush3.msra.mxu1 %v778_v42 }
 0x3a6   : > { %1903 = vmatprep.subr.mxu1 %v2588_v0 }
 0x3a7   : > { %1904 = vmatpush3.msra.mxu1 %v777_v43 }
 0x3a8   : > { %1905 = vmatprep.subr.mxu1 %v2588_v0 }
 0x3a9   : > { %1906 = vmatpush3.msra.mxu1 %v776_v44 }
 0x3aa   : > { %1907 = vmatprep.subr.mxu1 %v2588_v0 }
 0x3ab   : > { %1908 = vmatpush3.msra.mxu1 %v775_v45 }
 0x3ac   : > { %1909 = vmatprep.subr.mxu1 %v2588_v0 }
 0x3ad   : > { %1910 = vmatpush3.msra.mxu1 %v774_v46 }
 0x3ae   : > { %1911 = vmatprep.subr.mxu1 %v2588_v0 }
 0x3af   : > { %1912 = vmatpush3.msra.mxu1 %v773_v47 }
 0x3b0   : > { %1913 = vmatprep.subr.mxu1 %v2588_v0 }
 0x3b1   : > { %1914 = vmatpush3.msra.mxu1 %v772_v48 }
 0x3b2   : > { %1915 = vmatprep.subr.mxu1 %v2588_v0 }
 0x3b3   : > { %1916 = vmatpush3.msra.mxu1 %v771_v49 }
 0x3b4   : > { %1917 = vmatprep.subr.mxu1 %v2588_v0 }
 0x3b5   : > { %1918 = vmatpush3.msra.mxu1 %v770_v50 }
 0x3b6   : > { %1919 = vmatprep.subr.mxu1 %v2588_v0 }
 0x3b7   : > { %1920 = vmatpush3.msra.mxu1 %v769_v51 }
 0x3b8   : > { %1921 = vmatprep.subr.mxu1 %v2588_v0 }
 0x3b9   : > { %1922 = vmatpush3.msra.mxu1 %v768_v52 }
 0x3ba   : > { %1923 = vmatprep.subr.mxu1 %v2588_v0 }
 0x3bb   : > { %1924 = vmatpush3.msra.mxu1 %v767_v53 }
 0x3bc   : > { %1963 = vmatprep.subr.mxu1 %v2588_v0 }
 0x45c   : > { %v763_v54 = vpop.f32.mrf.mxu1 }
 0x45d   : > { %1926 = vmatmul.mubr.f32.vlgmr.msra.gmra.mxu1 %v763_v54  ;;  %v1210_v54 = vld [vmem:[#allocation11 + $0x78] sm:$0xff] }
 0x45e   : > { %v1892_v55 = vpop.f32.mrf.mxu1  ;;  %1995 = vmatprep.mubr.msk.f32.mxu1 %vm2589_vm0, %v2588_v0  ;;  %1964 = vmatpush3.msra.mxu1 %v895_v62  ;;  %v1203_v62 = vld [vmem:[#allocation11 + $0x40] sm:$0xff] }
 0x45f   : > { %1965 = vmatprep.subr.mxu1 %v2588_v0  ;;  %v1209_v55 = vld [vmem:[#allocation11 + $0x70] sm:$0xff] }
 0x460   : > { %1966 = vmatpush3.msra.mxu1 %v894_v63  ;;  %v1202_v63 = vld [vmem:[#allocation11 + $0x38] sm:$0xff] }
 0x461   : > { %1967 = vmatprep.subr.mxu1 %v2588_v0 }
 0x462   : > { %1968 = vmatpush3.msra.mxu1 %v893_v1  ;;  %v1201_v1 = vld [vmem:[#allocation11 + $0x30] sm:$0xff] }
 0x463   : > { %1969 = vmatprep.subr.mxu1 %v2588_v0 }
 0x464   : > { %1970 = vmatpush3.msra.mxu1 %v892_v2  ;;  %v1200_v2 = vld [vmem:[#allocation11 + $0x28] sm:$0xff] }
 0x465   : > { %1971 = vmatprep.subr.mxu1 %v2588_v0 }
 0x466   : > { %1972 = vmatpush3.msra.mxu1 %v891_v3  ;;  %v1199_v3 = vld [vmem:[#allocation11 + $0x20] sm:$0xff] }
 0x467   : > { %1973 = vmatprep.subr.mxu1 %v2588_v0 }
 0x468   : > { %1974 = vmatpush3.msra.mxu1 %v890_v4  ;;  %v1198_v4 = vld [vmem:[#allocation11 + $0x18] sm:$0xff] }
 0x469   : > { %1975 = vmatprep.subr.mxu1 %v2588_v0 }
 0x46a   : > { %1976 = vmatpush3.msra.mxu1 %v889_v12 }
 0x46b   : > { %1977 = vmatprep.subr.mxu1 %v2588_v0 }
 0x46c   : > { %1978 = vmatpush3.msra.mxu1 %v888_v13 }
 0x46d   : > { %1979 = vmatprep.subr.mxu1 %v2588_v0 }
 0x46e   : > { %1980 = vmatpush3.msra.mxu1 %v887_v14  ;;  %v1213_v14 = vsub.s32 3, %v2928_v19 }
 0x46f   : > { %1981 = vmatprep.subr.mxu1 %v2588_v0 }
 0x470   : > { %1982 = vmatpush3.msra.mxu1 %v886_v15  ;;  %v1214_v15 = vrot.slane %v2934_v21, %v1213_v14 }
 0x471   : > { %1983 = vmatprep.subr.mxu1 %v2588_v0 }
 0x472   : > { %1984 = vmatpush3.msra.mxu1 %v885_v16 }
 0x473   : > { %1985 = vmatprep.subr.mxu1 %v2588_v0 }
 0x51d   : > { %v853_v58 = vpop.f32.mrf.mxu1 }
 0x51e   : > { %v854_v59 = vadd.f32 %v853_v58, %v786_v57  ;;  %v1208_v57 = vld [vmem:[#allocation11 + $0x68] sm:$0xff]  ;;  %v1207_v58 = vld [vmem:[#allocation11 + $0x60] sm:$0xff] }
 0x51f   : > { %v1927_v60 = vpop.f32.mrf.mxu1 }
 0x520   : > { %v857_v61 = vadd.f32 %v854_v59, %v2920_v17  ;;  %v884_v17 = vld [vmem:[#allocation10 + $0x20] sm:$0xff]  ;;  %v1206_v59 = vld [vmem:[#allocation11 + $0x58] sm:$0xff]  ;;  %v1205_v60 = vld [vmem:[#allocation11 + $0x50] sm:$0xff] }
 0x521   : > { %1986 = vmatpush3.msra.mxu1 %v884_v17  ;;  %1951 = vmatpush3.msra.mxu0 %v884_v17 }
 0x522   : > { %858 = vadd.xlane.f32.xlu1 %v857_v61  ;;  %1987 = vmatprep.subr.mxu1 %v2588_v0 }
 0x523   : > { %1952 = vmatprep.subr.mxu0 %v2588_v0  ;;  %1988 = vmatpush3.msra.mxu1 %v883_v18 }
 0x524   : > { %1953 = vmatpush3.msra.mxu0 %v883_v18  ;;  %1989 = vmatprep.subr.mxu1 %v2588_v0 }
 0x525   : > { %1954 = vmatprep.subr.mxu0 %v2588_v0  ;;  %1990 = vmatpush3.msra.mxu1 %v882_v22 }
 0x526   : > { %1955 = vmatpush3.msra.mxu0 %v882_v22  ;;  %1991 = vmatprep.subr.mxu1 %v2588_v0 }
 0x527   : > { %1956 = vmatprep.subr.mxu0 %v2588_v0  ;;  %1992 = vmatpush3.msra.mxu1 %v881_v23 }
 0x528   : > { %1957 = vmatpush3.msra.mxu0 %v881_v23  ;;  %1993 = vmatprep.subr.mxu1 %v2588_v0  ;;  %v1323_v23 = vld [vmem:[#allocation13 + $0x78] sm:$0xff] }
 0x529   : > { %1958 = vmatprep.subr.mxu0 %v2588_v0  ;;  %1994 = vmatpush3.msra.mxu1 %v880_v24 }
 0x52a   : > { %1959 = vmatpush3.msra.mxu0 %v880_v24  ;;  %1996 = vmatmul.mubr.f32.vlgmr.msra.gmra.mxu1 %v512_v25  ;;  %v1322_v24 = vld [vmem:[#allocation13 + $0x70] sm:$0xff]  ;;  %v1321_v25 = vld [vmem:[#allocation13 + $0x68] sm:$0xff] }
 0x52b   : > { %1998 = vmatprep.subr.mxu1 %v2588_v0  ;;  %2000 = vmatprep.mubr.msk.f32.mxu1 %vm2589_vm0, %v2588_v0 }
 0x52c   : > { %2008 = vmatprep.subr.mxu0 %v2588_v0 }
 0x5ab   : > { %v859_v6 = vpop.xlane.xlu1 %858 }
 0x5ac   : > { %v860_v7 = vmul.f32 0.03125, %v859_v6  ;;  %v1196_v6 = vld [vmem:[#allocation11 + $0x8] sm:$0xff] }
 0x5ae   : > { %v2987_v9 = vsub.f32 %v857_v61, %v860_v7  ;;  %v1204_v61 = vld [vmem:[#allocation11 + $0x48] sm:$0xff] }
 0x5b0   : > { %v862_v10 = vmul.f32 %v2985_v8, %v2987_v9 }
 0x5b2   : > { %v863_v11 = vmul.f32 %v862_v10, %v862_v10 }
 0x5b4   : > { %864 = vadd.xlane.f32.xlu1 %v863_v11  ;;  %v1195_v11 = vld [vmem:[#allocation11] sm:$0xff] }
 0x5ea   : > { %v1036_v39 = vpop.f32.mrf.mxu1 }
 0x5eb   : > { %v1037_v40 = vadd.f32 %v1036_v39, %v899_v38  ;;  %v1313_v39 = vld [vmem:[#allocation13 + $0x28] sm:$0xff] }
 0x5ec   : > { %v1997_v41 = vpop.f32.mrf.mxu1 }
 0x5ed   : > { %1999 = vmatpush3.xpose.msra.mxu1 %v1037_v40  ;;  %v1311_v41 = vld [vmem:[#allocation13 + $0x18] sm:$0xff] }
 0x5ee   : > { %2003 = vmatprep.subr.mxu1 %v2588_v0 }
 0x63d   : > { %v865_v26 = vpop.xlane.xlu1 %864 }
 0x63e   : > { %v866_v27 = vmul.f32 0.03125, %v865_v26  ;;  %v1320_v26 = vld [vmem:[#allocation13 + $0x60] sm:$0xff] }
 0x640   : > { %v867_v28 = vadd.f32 1e-05, %v866_v27 }
 0x642   : > { %2243 = vrsqrt.f32 %v867_v28 }
 0x64f   : > { %v2244_v32 = vpop.eup %2243 }
 0x650   : > { %v869_v33 = vmul.f32 %v2244_v32, %v2987_v9  ;;  %v1319_v32 = vld [vmem:[#allocation13 + $0x58] sm:$0xff] }
 0x652   : > { %v874_v35 = vmul.f32 %v873_v31, %v869_v33  ;;  %v1318_v33 = vld [vmem:[#allocation13 + $0x50] sm:$0xff] }
 0x654   : > { %v3020_v36 = vadd.f32 %v878_v34, %v874_v35  ;;  %v1317_v34 = vld [vmem:[#allocation13 + $0x48] sm:$0xff]  ;;  %v1316_v35 = vld [vmem:[#allocation13 + $0x40] sm:$0xff] }
 0x656   : > { %1961 = vmatmul.mubr.f32.vlgmr.msra.gmra.mxu0 %v3020_v36 }
 0x657   : > { %2040 = vmatprep.mubr.msk.f32.mxu0 %vm2589_vm0, %v2588_v0  ;;  %2009 = vmatpush3.msra.mxu0 %v1210_v54  ;;  %v1407_v54 = vld [vmem:[#allocation14 + $0x30] sm:$0xff] }
 0x658   : > { %2010 = vmatprep.subr.mxu0 %v2588_v0 }
 0x659   : > { %2011 = vmatpush3.msra.mxu0 %v1209_v55  ;;  %v1406_v55 = vld [vmem:[#allocation14 + $0x28] sm:$0xff] }
 0x65a   : > { %2012 = vmatprep.subr.mxu0 %v2588_v0 }
 0x65b   : > { %2013 = vmatpush3.msra.mxu0 %v1208_v57  ;;  %v1405_v57 = vld [vmem:[#allocation14 + $0x20] sm:$0xff] }
 0x65c   : > { %2014 = vmatprep.subr.mxu0 %v2588_v0 }
 0x65d   : > { %2015 = vmatpush3.msra.mxu0 %v1207_v58  ;;  %v1404_v58 = vld [vmem:[#allocation14 + $0x18] sm:$0xff] }
 0x65e   : > { %2016 = vmatprep.subr.mxu0 %v2588_v0 }
 0x65f   : > { %2017 = vmatpush3.msra.mxu0 %v1206_v59 }
 0x660   : > { %2018 = vmatprep.subr.mxu0 %v2588_v0 }
 0x661   : > { %2019 = vmatpush3.msra.mxu0 %v1205_v60 }
 0x662   : > { %2020 = vmatprep.subr.mxu0 %v2588_v0 }
 0x663   : > { %2021 = vmatpush3.msra.mxu0 %v1204_v61 }
 0x664   : > { %2022 = vmatprep.subr.mxu0 %v2588_v0 }
 0x665   : > { %2023 = vmatpush3.msra.mxu0 %v1203_v62  ;;  %v1300_v62 = vsub.s32 7, %v2928_v19 }
 0x666   : > { %2024 = vmatprep.subr.mxu0 %v2588_v0 }
 0x667   : > { %2025 = vmatpush3.msra.mxu0 %v1202_v63  ;;  %v514_v63 = vld [vmem:[%s3153_s9 + $0x8] sm:$0xff] }
 0x668   : > { %2026 = vmatprep.subr.mxu0 %v2588_v0 }
 0x669   : > { %2027 = vmatpush3.msra.mxu0 %v1201_v1  ;;  %v1301_v1 = vrot.slane %v2934_v21, %v1300_v62 }
 0x66a   : > { %2028 = vmatprep.subr.mxu0 %v2588_v0 }
 0x66b   : > { %2029 = vmatpush3.msra.mxu0 %v1200_v2 }
 0x66c   : > { %2030 = vmatprep.subr.mxu0 %v2588_v0 }
 0x66d   : > { %2031 = vmatpush3.msra.mxu0 %v1199_v3  ;;  %v1306_v3 = vrot.slane %v514_v63, %v539_v20 }
 0x66e   : > { %2032 = vmatprep.subr.mxu0 %v2588_v0 }
 0x66f   : > { %2033 = vmatpush3.msra.mxu0 %v1198_v4 }
 0x670   : > { %2034 = vmatprep.subr.mxu0 %v2588_v0 }
 0x671   : > { %2035 = vmatpush3.msra.mxu0 %v1197_v5 }
 0x672   : > { %2036 = vmatprep.subr.mxu0 %v2588_v0 }
 0x673   : > { %2037 = vmatpush3.msra.mxu0 %v1196_v6 }
 0x674   : > { %2038 = vmatprep.subr.mxu0 %v2588_v0 }
 0x675   : > { %2039 = vmatpush3.msra.mxu0 %v1195_v11  ;;  %v1716_v11 = vld [vmem:[#allocation16] ss:$0 sm:$0xff] }
 0x676   : > { %2078 = vmatprep.subr.mxu0 %v2588_v0 }
 0x716   : > { %v966_v42 = vpop.f32.mrf.mxu0 }
 0x717   : > { %v967_v43 = vadd.f32 %v966_v42, %v899_v38  ;;  %v1314_v38 = vld [vmem:[#allocation13 + $0x30] sm:$0xff] }
 0x718   : > { %v1962_v44 = vpop.f32.mrf.mxu0  ;;  %v1310_v42 = vld [vmem:[#allocation13 + $0x10] sm:$0xff] }
 0x719   : > { %v1040_v45 = vmul.f32 0.17677669, %v967_v43  ;;  %v1309_v43 = vld [vmem:[#allocation13 + $0x8] sm:$0xff]  ;;  %v1308_v44 = vld [vmem:[#allocation13] sm:$0xff] }
 0x71b   : > { %2001 = vmatmul.mubr.f32.vlgmr.msra.gmra.mxu1 %v1040_v45  ;;  %v1416_v45 = vld [vmem:[#allocation14 + $0x78] sm:$0xff] }
 0x71c   : > { %2004 = vmatpush3.msra.mxu1 %v1037_v40  ;;  %2005 = vmatprep.mubr.msk.f32.mxu1 %vm2589_vm0, %v2588_v0  ;;  %v1312_v40 = vld [vmem:[#allocation13 + $0x20] sm:$0xff] }
 0x71d   : > { %2043 = vmatprep.subr.mxu1 %v2588_v0 }
 0x7db   : > { %v1107_v46 = vpop.f32.mrf.mxu1 }
 0x7dc   : > { %v1111_v47 = vsel %vm682_vm1, %v1107_v46, -inf }
 0x7dd   : > { %1112 = vmax.xlane.f32.xlu0 %v1111_v47  ;;  %v2002_v48 = vpop.f32.mrf.mxu1  ;;  %v1414_v47 = vld [vmem:[#allocation14 + $0x68] sm:$0xff] }
 0x7de   : > { %v1413_v48 = vld [vmem:[#allocation14 + $0x60] sm:$0xff] }
 0x866   : > { %v1113_v49 = vpop.xlane.xlu0 %1112 }
 0x867   : > { %v1114_v50 = vsub.f32 %v1107_v46, %v1113_v49  ;;  %v1415_v46 = vld [vmem:[#allocation14 + $0x70] sm:$0xff]  ;;  %v1412_v49 = vld [vmem:[#allocation14 + $0x58] sm:$0xff] }
 0x869   : > { %v1115_v51 = vmul.f32 1.442695, %v1114_v50  ;;  %v1411_v50 = vld [vmem:[#allocation14 + $0x50] sm:$0xff] }
 0x86b   : > { %2245 = vpow2.f32 %v1115_v51  ;;  %v1410_v51 = vld [vmem:[#allocation14 + $0x48] sm:$0xff] }
 0x878   : > { %v2246_v52 = vpop.eup %2245 }
 0x879   : > { %v1117_v53 = vsel %vm682_vm1, %v2246_v52, 0.0 }
 0x87a   : > { %1118 = vadd.xlane.f32.xlu1 %v1117_v53  ;;  %v1408_v53 = vld [vmem:[#allocation14 + $0x38] sm:$0xff] }
 0x903   : > { %v1119_v7 = vpop.xlane.xlu1 %1118 }
 0x904   : > { %2247 = vrcp.f32 %v1119_v7  ;;  %v1403_v7 = vld [vmem:[#allocation14 + $0x10] sm:$0xff] }
 0x911   : > { %v2248_v9 = vpop.eup %2247 }
 0x912   : > { %v1121_v10 = vmul.f32 %v2248_v9, %v2246_v52  ;;  %v1409_v52 = vld [vmem:[#allocation14 + $0x40] sm:$0xff]  ;;  %v1402_v9 = vld [vmem:[#allocation14 + $0x8] sm:$0xff] }
 0x914   : > { %2006 = vmatmul.mubr.msk.f32.vlgmr.msra.gmra.mxu1 %vm682_vm1, %v1121_v10  ;;  %v1401_v10 = vld [vmem:[#allocation14] sm:$0xff] }
 0x915   : > { %2075 = vmatprep.mubr.msk.f32.mxu1 %vm2589_vm0, %v2588_v0  ;;  %2044 = vmatpush3.msra.mxu1 %v1323_v23 }
 0x916   : > { %2045 = vmatprep.subr.mxu1 %v2588_v0 }
 0x917   : > { %2046 = vmatpush3.msra.mxu1 %v1322_v24 }
 0x918   : > { %2047 = vmatprep.subr.mxu1 %v2588_v0 }
 0x919   : > { %2048 = vmatpush3.msra.mxu1 %v1321_v25 }
 0x91a   : > { %2049 = vmatprep.subr.mxu1 %v2588_v0 }
 0x91b   : > { %2050 = vmatpush3.msra.mxu1 %v1320_v26 }
 0x91c   : > { %2051 = vmatprep.subr.mxu1 %v2588_v0 }
 0x91d   : > { %2052 = vmatpush3.msra.mxu1 %v1319_v32  ;;  %v1512_v32 = vrot.slane %v514_v63, %v898_v37 }
 0x91e   : > { %2053 = vmatprep.subr.mxu1 %v2588_v0 }
 0x91f   : > { %2054 = vmatpush3.msra.mxu1 %v1318_v33 }
 0x920   : > { %2055 = vmatprep.subr.mxu1 %v2588_v0 }
 0x921   : > { %2056 = vmatpush3.msra.mxu1 %v1317_v34 }
 0x922   : > { %2057 = vmatprep.subr.mxu1 %v2588_v0 }
 0x923   : > { %2058 = vmatpush3.msra.mxu1 %v1316_v35 }
 0x924   : > { %2059 = vmatprep.subr.mxu1 %v2588_v0 }
 0x9d4   : > { %v1191_v12 = vpop.f32.mrf.mxu1 }
 0x9d5   : > { %2041 = vmatmul.mubr.f32.vlgmr.msra.gmra.mxu0 %v1191_v12 }
 0x9d6   : > { %v2007_v13 = vpop.f32.mrf.mxu1  ;;  %2110 = vmatprep.mubr.msk.f32.mxu0 %vm2589_vm0, %v2588_v0  ;;  %2079 = vmatpush3.msra.mxu0 %v1416_v45 }
 0x9d7   : > { %2080 = vmatprep.subr.mxu0 %v2588_v0 }
 0x9d8   : > { %2081 = vmatpush3.msra.mxu0 %v1415_v46 }
 0x9d9   : > { %2082 = vmatprep.subr.mxu0 %v2588_v0 }
 0x9da   : > { %2083 = vmatpush3.msra.mxu0 %v1414_v47 }
 0x9db   : > { %2084 = vmatprep.subr.mxu0 %v2588_v0 }
 0x9dc   : > { %2085 = vmatpush3.msra.mxu0 %v1413_v48 }
 0x9dd   : > { %2086 = vmatprep.subr.mxu0 %v2588_v0 }
 0x9de   : > { %2087 = vmatpush3.msra.mxu0 %v1412_v49 }
 0x9df   : > { %2088 = vmatprep.subr.mxu0 %v2588_v0 }
 0x9e0   : > { %2089 = vmatpush3.msra.mxu0 %v1411_v50 }
 0x9e1   : > { %2090 = vmatprep.subr.mxu0 %v2588_v0 }
 0x9e2   : > { %2091 = vmatpush3.msra.mxu0 %v1410_v51 }
 0x9e3   : > { %2092 = vmatprep.subr.mxu0 %v2588_v0 }
 0x9e4   : > { %2093 = vmatpush3.msra.mxu0 %v1409_v52 }
 0x9e5   : > { %2094 = vmatprep.subr.mxu0 %v2588_v0 }
 0x9e6   : > { %2095 = vmatpush3.msra.mxu0 %v1408_v53 }
 0x9e7   : > { %2096 = vmatprep.subr.mxu0 %v2588_v0 }
 0x9e8   : > { %2097 = vmatpush3.msra.mxu0 %v1407_v54 }
 0x9e9   : > { %2098 = vmatprep.subr.mxu0 %v2588_v0 }
 0x9ea   : > { %2099 = vmatpush3.msra.mxu0 %v1406_v55 }
 0x9eb   : > { %2100 = vmatprep.subr.mxu0 %v2588_v0 }
 0x9ec   : > { %2101 = vmatpush3.msra.mxu0 %v1405_v57 }
 0x9ed   : > { %2102 = vmatprep.subr.mxu0 %v2588_v0 }
 0x9ee   : > { %2103 = vmatpush3.msra.mxu0 %v1404_v58 }
 0x9ef   : > { %2104 = vmatprep.subr.mxu0 %v2588_v0 }
 0x9f0   : > { %2105 = vmatpush3.msra.mxu0 %v1403_v7 }
 0x9f1   : > { %2106 = vmatprep.subr.mxu0 %v2588_v0 }
 0x9f2   : > { %2107 = vmatpush3.msra.mxu0 %v1402_v9 }
 0x9f3   : > { %2108 = vmatprep.subr.mxu0 %v2588_v0 }
 0x9f4   : > { %2109 = vmatpush3.msra.mxu0 %v1401_v10 }
 0xa95   : > { %v1281_v16 = vpop.f32.mrf.mxu0 }
 0xa96   : > { %v1282_v17 = vadd.f32 %v1281_v16, %v1214_v15  ;;  %v1419_v15 = vsub.s32 4, %v2928_v19 }
 0xa97   : > { %v2042_v18 = vpop.f32.mrf.mxu0 }
 0xa98   : > { %v1285_v22 = vadd.f32 %v1282_v17, %v3020_v36  ;;  %v1315_v36 = vld [vmem:[#allocation13 + $0x38] sm:$0xff]  ;;  %v1420_v16 = vrot.slane %v2934_v21, %v1419_v15  ;;  %v1507_v21 = vrot.slane %v514_v63, %v785_v56 }
 0xa99   : > { %2060 = vmatpush3.msra.mxu1 %v1315_v36 }
 0xa9a   : > { %1286 = vadd.xlane.f32.xlu0 %v1285_v22  ;;  %2061 = vmatprep.subr.mxu1 %v2588_v0 }
 0xa9b   : > { %2062 = vmatpush3.msra.mxu1 %v1314_v38 }
 0xa9c   : > { %2063 = vmatprep.subr.mxu1 %v2588_v0 }
 0xa9d   : > { %2064 = vmatpush3.msra.mxu1 %v1313_v39 }
 0xa9e   : > { %2065 = vmatprep.subr.mxu1 %v2588_v0 }
 0xa9f   : > { %2066 = vmatpush3.msra.mxu1 %v1312_v40 }
 0xaa0   : > { %2067 = vmatprep.subr.mxu1 %v2588_v0 }
 0xaa1   : > { %2068 = vmatpush3.msra.mxu1 %v1311_v41 }
 0xaa2   : > { %2069 = vmatprep.subr.mxu1 %v2588_v0 }
 0xaa3   : > { %2070 = vmatpush3.msra.mxu1 %v1310_v42 }
 0xaa4   : > { %2071 = vmatprep.subr.mxu1 %v2588_v0 }
 0xaa5   : > { %2072 = vmatpush3.msra.mxu1 %v1309_v43 }
 0xaa6   : > { %2073 = vmatprep.subr.mxu1 %v2588_v0 }
 0xaa7   : > { %2074 = vmatpush3.msra.mxu1 %v1308_v44 }
 0xb23   : > { %v1287_v27 = vpop.xlane.xlu0 %1286 }
 0xb24   : > { %v1288_v28 = vmul.f32 0.03125, %v1287_v27 }
 0xb26   : > { %v3063_v29 = vsub.f32 %v1285_v22, %v1288_v28 }
 0xb28   : > { %v1290_v30 = vmul.f32 %v2985_v8, %v3063_v29 }
 0xb2a   : > { %v1291_v31 = vmul.f32 %v1290_v30, %v1290_v30 }
 0xb2c   : > { %1292 = vadd.xlane.f32.xlu1 %v1291_v31 }
 0xbb5   : > { %v1293_v59 = vpop.xlane.xlu1 %1292 }
 0xbb6   : > { %v1294_v60 = vmul.f32 0.03125, %v1293_v59 }
 0xbb8   : > { %v1295_v61 = vadd.f32 1e-05, %v1294_v60 }
 0xbba   : > { %2249 = vrsqrt.f32 %v1295_v61 }
 0xbc7   : > { %v2250_v2 = vpop.eup %2249 }
 0xbc8   : > { %v1297_v4 = vmul.f32 %v2250_v2, %v3063_v29 }
 0xbca   : > { %v1302_v5 = vmul.f32 %v1301_v1, %v1297_v4 }
 0xbcc   : > { %v1307_v6 = vadd.f32 %v1306_v3, %v1302_v5 }
 0xbce   : > { %2076 = vmatmul.mubr.f32.vlgmr.msra.gmra.mxu1 %v1307_v6 }
 0xc8e   : > { %v1396_v12 = vpop.f32.mrf.mxu1 }
 0xc8f   : > { %v1397_v13 = vadd.f32 %v1716_v11, %v1396_v12 }
 0xc90   : > { %v2077_v14 = vpop.f32.mrf.mxu1 }
 0xc91   : > { %v1400_v20 = vmax.f32 %v1397_v13, 0.0 }
 0xc93   : > { %2111 = vmatmul.mubr.f32.vlgmr.msra.gmra.mxu0 %v1400_v20 }
 0xd53   : > { %v1487_v17 = vpop.f32.mrf.mxu0 }
 0xd54   : > { %v1488_v18 = vadd.f32 %v1487_v17, %v1420_v16 }
 0xd55   : > { %v2112_v22 = vpop.f32.mrf.mxu0 }
 0xd56   : > { %v1491_v23 = vadd.f32 %v1488_v18, %v1307_v6 }
 0xd58   : > { %1492 = vadd.xlane.f32.xlu0 %v1491_v23 }
 0xde1   : > { %v1493_v24 = vpop.xlane.xlu0 %1492 }
 0xde2   : > { %v1494_v0 = vmul.f32 0.03125, %v1493_v24 }
 0xde4   : > { %v1495_v25 = vsub.f32 %v1491_v23, %v1494_v0 }
 0xde6   : > { %v1496_v26 = vmul.f32 %v2985_v8, %v1495_v25 }
 0xde8   : > { %v1497_v27 = vmul.f32 %v1496_v26, %v1496_v26 }
 0xdea   : > { %1498 = vadd.xlane.f32.xlu1 %v1497_v27 }
 0xe73   : > { %v1499_v28 = vpop.xlane.xlu1 %1498 }
 0xe74   : > { %v1500_v29 = vmul.f32 0.03125, %v1499_v28 }
 0xe76   : > { %v1501_v30 = vadd.f32 1e-05, %v1500_v29 }
 0xe78   : > { %2251 = vrsqrt.f32 %v1501_v30 }
 0xe85   : > { %v2252_v31 = vpop.eup %2251 }
 0xe86   : > { %v1503_v33 = vmul.f32 %v2252_v31, %v1495_v25 }
 0xe88   : > { %v1508_v8 = vmul.f32 %v1507_v21, %v1503_v33 }
 0xe8a   : > { %v1513_v34 = vadd.f32 %v1512_v32, %v1508_v8 }
 0xe8c   : > { %1514 = vst [vmem:[%s510_s25] sm:$0xff] %v1513_v34 }
 0xe8d   : > { %2504 = shalt.err (!%p2501_p8)
}
 0xe8e   : > { %s2505_s7 = scalar_lea.hbm %s1527_s26, 128  ;;  %s2509_s29 = scalar_lea.hbm %s3154_s10, 256 }
 0xe8f   : > { %p2506_p6 = scmp.ne.s32.totalorder %s1527_s26, %s2505_s7  ;;  %p2510_p5 = scmp.lt.s32.totalorder %s1527_s26, %s3154_s10 }
 0xe90   : > { %p2511_p9 = scmp.lt.s32.totalorder %s2509_s29, %s2505_s7 }
 0xe91   : > { %p2507_p11 = pnand %p2506_p6, %p3190_p13 }
 0xe92   : > { %p2512_p10 = por %p2511_p9, %p2510_p5 }
 0xe93   : > { %p2508_p2 = pneg %p2507_p11 }
 0xe95   : > { %p2513_p12 = pnand %p2512_p10, %p2508_p2 }
 0xe97   : > { %2516 = shalt.err (!%p2513_p12)
}
 0xe98   : > { %2145 = dma.vmem_to_hbm [thread:$0]  (%p3190_p13), %s1530_s5, 128, %s1527_s26, %s1516_s24  }
 0xe99 PF: > { %s1541_s18 = sand.u32 1, %s2563_s13   ;;  %p3191_p1 = scmp.ne.s32.totalorder %s3178_s12, 0 }
 0xe9a   : > { %p3192_p3 = scmp.ge.s32.totalorder %s2575_s16, 2  ;;  %s1542_s2 = scalar_lea.sflag [#allocation4], %s1541_s18 }
 0xe9c   : > { %p2177_p4 = pnand %p3192_p3, %p3191_p1 }
 0xe9e   : > { %p2178_p0 = pneg %p2177_p4 }
 0xea0   : > { %2558 = dma.done.wait (%p2178_p0), %s1542_s2, 128  }
 0xea1   : > { %2560 = vsyncadd (%p2178_p0), %s1542_s2, 4294967168  ;;  %p29_p7 = scmp.ge.s32.totalorder %s2774_s23, 4   ;;  %s3193_s13 = smov %s2567_s14 }
 0xea2   : > { %s3194_s14 = smov %s2571_s15  ;;  %s3195_s15 = smov %s2786_s30 }
 0xea3   : > { %s3196_s16 = smov %s2774_s23  ;;  %31 = sbr.rel (!%p29_p7) target bundleno = 18 (0x12), region = 146 }
 0xea8   :  { %1547 = vsyncpa [#allocation3], 1 }
 0xea9   :  { %1549 = vsyncpa [#allocation3 + $0x1], 1 }
 0xeaa   :  { %1550 = vsyncpa [#allocation6], 1 }
 0xeab   :  { %1552 = vsyncpa [#allocation6 + $0x1], 1 }
 0xeac   :  { %1553 = vsyncpa [#allocation9], 1 }
 0xead   :  { %1554 = vsyncpa [#allocation12], 1 }
 0xeae   :  { %1555 = vsyncpa [#allocation15], 1 }
 0xeaf   :  { %1556 = vsyncpa [#allocation4], 1 }
 0xeb0   :  { %1558 = vsyncpa [#allocation4 + $0x1], 1 }

</bundles_post_ra>
